<compile_context>
chip_gen: v5e
topology: v5e:2x2
jax: 0.10.0
libtpu: 0.0.40
codegen_flags: <defaults>
</compile_context>

<pallas_src>
import functools

import jax
import jax.numpy as jnp
from jax.experimental import pallas as pl
from jax.experimental.pallas import tpu as pltpu

OCP = 128  # padded channel width (one full lane group)


# ---------------------------------------------------------------------------
# Fused kernel: conv1 -> conv2 -> conv3 -> fc1 -> fc2 for `bc` images.
#   x_ref   : (bc*oh1*ow1, 8*8*C)  bf16  conv1 im2col patches, parity-ordered rows
#   w1_ref  : (8*8*C, 128)         bf16
#   w2_ref  : (4*4*128, 128)       bf16   K index = (u*4+v)*128 + c
#   w3_ref  : (3*3*128, 128)       bf16   K index = (u*3+v)*128 + c
#   wf1_ref : (oh3*ow3, 128, 512)  bf16   torch NCHW-flatten order pre-permuted
#   wf2_ref : (512, 128)           bf16
#   b*_ref  : (1, width)           f32
#   o_ref   : (bc, 128)            f32    (real n_out columns sliced off outside)
# ---------------------------------------------------------------------------
def _dqn_kernel(x_ref, w1_ref, b1_ref, w2_ref, b2_ref, w3_ref, b3_ref,
                wf1_ref, bf1_ref, wf2_ref, bf2_ref, o_ref, *,
                bc, oh1, ow1, oh2, ow2, oh3, ow3):
    m1, m2, np3 = oh1 * ow1, oh2 * ow2, oh3 * ow3
    sr_w = ow1 // 2                    # width of one conv1-output parity slab
    slab = (oh1 // 2) * sr_w           # rows per parity slab of y1

    def cat(parts, axis):
        return parts[0] if len(parts) == 1 else jnp.concatenate(parts, axis=axis)

    # ---- conv1: one dot, M = bc*oh1*ow1, K = 8*8*C, N = 128 ----------------
    acc1 = jnp.dot(x_ref[...], w1_ref[...], preferred_element_type=jnp.float32)
    y1 = jnp.maximum(acc1 + b1_ref[...], 0.0)                 # (bc*m1, 128) f32
    # y1 rows: image-major, then parity slab (i1%2, j1%2), then (i1//2, j1//2);
    # every access below is therefore a unit-stride static slice.

    # ---- conv2 (4x4, stride 2): one (bc*m2, 16*128) patch matrix, one dot ---
    p2_imgs = []
    for b in range(bc):
        y1b = y1[b * m1:(b + 1) * m1, :]
        blocks = []
        for u in range(4):
            for v in range(4):
                base = (((u % 2) * 2 + (v % 2)) * slab
                        + (u // 2) * sr_w + (v // 2))
                rows = [y1b[base + i2 * sr_w: base + i2 * sr_w + ow2, :]
                        for i2 in range(oh2)]
                blocks.append(cat(rows, 0))                   # (m2, 128)
        p2_imgs.append(cat(blocks, 1))                        # (m2, 2048)
    p2 = cat(p2_imgs, 0).astype(jnp.bfloat16)                 # (bc*m2, 2048)
    acc2 = jnp.dot(p2, w2_ref[...], preferred_element_type=jnp.float32)
    y2 = jnp.maximum(acc2 + b2_ref[...], 0.0)                 # (bc*m2, 128) f32

    # ---- conv3 (3x3, stride 1): one (bc*np3, 9*128) patch matrix, one dot ---
    p3_imgs = []
    for b in range(bc):
        y2b = y2[b * m2:(b + 1) * m2, :]
        blocks = []
        for u in range(3):
            for v in range(3):
                rows = [y2b[(i3 + u) * ow2 + v: (i3 + u) * ow2 + v + ow3, :]
                        for i3 in range(oh3)]
                blocks.append(cat(rows, 0))                   # (np3, 128)
        p3_imgs.append(cat(blocks, 1))                        # (np3, 1152)
    p3 = cat(p3_imgs, 0).astype(jnp.bfloat16)                 # (bc*np3, 1152)
    acc3 = jnp.dot(p3, w3_ref[...], preferred_element_type=jnp.float32)
    y3 = jnp.maximum(acc3 + b3_ref[...], 0.0)                 # (bc*np3, 128) f32

    # ---- fc1 + ReLU + fc2 (batch folded into M = bc) ------------------------
    if np3 == 1:
        h = jnp.dot(y3.astype(jnp.bfloat16), wf1_ref[0],
                    preferred_element_type=jnp.float32)
    else:
        h = jnp.zeros((bc, wf1_ref.shape[-1]), jnp.float32)
        for p in range(np3):
            lhs = cat([y3[b * np3 + p: b * np3 + p + 1, :] for b in range(bc)], 0)
            h = h + jnp.dot(lhs.astype(jnp.bfloat16), wf1_ref[p],
                            preferred_element_type=jnp.float32)
    h = jnp.maximum(h + bf1_ref[...], 0.0)                    # (bc, 512) f32
    out = jnp.dot(h.astype(jnp.bfloat16), wf2_ref[...],
                  preferred_element_type=jnp.float32) + bf2_ref[...]
    o_ref[...] = out.astype(o_ref.dtype)                      # one lane-dense store


# ---------------------------------------------------------------------------
# JAX-side prep (one small XLA fusion feeding the single kernel):
# NCHW -> conv1 im2col patches, rows ordered by conv1-output parity, bf16.
# ---------------------------------------------------------------------------
def _conv1_patches(x, oh1, ow1):
    B, C, H, W = x.shape
    xh = x.astype(jnp.bfloat16).transpose(0, 2, 3, 1)                # (B,H,W,C)
    pieces = [xh[:, u:u + 4 * (oh1 - 1) + 1:4, v:v + 4 * (ow1 - 1) + 1:4, :]
              for u in range(8) for v in range(8)]                    # (B,oh1,ow1,C)
    pat = jnp.concatenate(pieces, axis=-1)                            # K=(u*8+v)*C+c
    pat = pat.reshape(B, oh1 // 2, 2, ow1 // 2, 2, 64 * C)
    pat = pat.transpose(0, 2, 4, 1, 3, 5)                             # (B,pe,qe,r,t,K)
    return pat.reshape(B * oh1 * ow1, 64 * C)


# ---------------------------------------------------------------------------
# Parameters: torch-layout init, then a one-time conversion into kernel layouts.
# ---------------------------------------------------------------------------
def init_params(key, n_in, n_out):
    c_in, h, w = n_in
    ks = jax.random.split(key, 5)

    def conv_init(k, oc, ic, kh, kw):
        fan_in = ic * kh * kw
        bound = 1.0 / jnp.sqrt(float(fan_in))
        kw_, kb_ = jax.random.split(k)
        wgt = jax.random.uniform(kw_, (oc, ic, kh, kw), jnp.float32, -bound, bound)
        bias = jax.random.uniform(kb_, (oc,), jnp.float32, -bound, bound)
        return wgt, bias

    def linear_init(k, in_f, out_f):
        # xavier_uniform_ weight, bias = 0.01 (matches DQN.init_weights)
        bound = jnp.sqrt(6.0 / float(in_f + out_f))
        wgt = jax.random.uniform(k, (out_f, in_f), jnp.float32, -bound, bound)
        bias = jnp.full((out_f,), 0.01, jnp.float32)
        return wgt, bias

    conv = [conv_init(ks[0], 32, c_in, 8, 8) + (4,),
            conv_init(ks[1], 64, 32, 4, 4) + (2,),
            conv_init(ks[2], 64, 64, 3, 3) + (1,)]

    def out_dim(s, k, st):
        return (s - k) // st + 1

    oh = out_dim(out_dim(out_dim(h, 8, 4), 4, 2), 3, 1)
    ow = out_dim(out_dim(out_dim(w, 8, 4), 4, 2), 3, 1)
    conv_out_size = 64 * oh * ow          # same as torch's _get_conv_out

    fc1 = linear_init(ks[3], conv_out_size, 512)
    fc2 = linear_init(ks[4], 512, n_out)
    return {"conv": conv, "fc1": fc1, "fc2": fc2}


def prepare_params(params, n_in):
    """One-time conversion: pad channels to 128 lanes, reshape every conv weight
    into the kernel's (KH*KW*Cp, 128) layout, permute fc1 to the torch NCHW
    flatten order, cast to bf16."""
    c_in, H, W = n_in
    (w1c, b1c, s1), (w2c, b2c, s2), (w3c, b3c, s3) = params["conv"]
    assert (s1, s2, s3) == (4, 2, 1)
    oc1, oc2, oc3 = w1c.shape[0], w2c.shape[0], w3c.shape[0]
    oh1, ow1 = (H - 8) // 4 + 1, (W - 8) // 4 + 1
    oh2, ow2 = (oh1 - 4) // 2 + 1, (ow1 - 4) // 2 + 1
    oh3, ow3 = oh2 - 2, ow2 - 2
    assert oh1 % 2 == 0 and ow1 % 2 == 0 and oh3 >= 1 and ow3 >= 1
    np3 = oh3 * ow3

    # conv1: (32, C, 8, 8) -> (8*8*C, 128), K index = (u*8+v)*C + c
    w1m = jnp.pad(w1c.transpose(2, 3, 1, 0), ((0, 0), (0, 0), (0, 0), (0, OCP - oc1)))
    w1m = w1m.reshape(8 * 8 * c_in, OCP).astype(jnp.bfloat16)
    b1m = jnp.pad(b1c, (0, OCP - oc1)).reshape(1, OCP).astype(jnp.float32)

    # conv2: (64, 32, 4, 4) -> (4*4*128, 128), K index = (u*4+v)*128 + c
    w2m = jnp.pad(w2c.transpose(2, 3, 1, 0),
                  ((0, 0), (0, 0), (0, OCP - oc1), (0, OCP - oc2)))
    w2m = w2m.reshape(16 * OCP, OCP).astype(jnp.bfloat16)
    b2m = jnp.pad(b2c, (0, OCP - oc2)).reshape(1, OCP).astype(jnp.float32)

    # conv3: (64, 64, 3, 3) -> (3*3*128, 128), K index = (u*3+v)*128 + c
    w3m = jnp.pad(w3c.transpose(2, 3, 1, 0),
                  ((0, 0), (0, 0), (0, OCP - oc2), (0, OCP - oc3)))
    w3m = w3m.reshape(9 * OCP, OCP).astype(jnp.bfloat16)
    b3m = jnp.pad(b3c, (0, OCP - oc3)).reshape(1, OCP).astype(jnp.float32)

    # fc1: torch flatten index = c*(oh3*ow3) + p  ->  (P, 128, 512)
    wf1t, bf1t = params["fc1"]                                        # (512, 64*P)
    hdim = wf1t.shape[0]
    wf1m = wf1t.T.reshape(oc3, np3, hdim).transpose(1, 0, 2)          # (P, 64, 512)
    wf1m = jnp.pad(wf1m, ((0, 0), (0, OCP - oc3), (0, 0))).astype(jnp.bfloat16)
    bf1m = bf1t.reshape(1, hdim).astype(jnp.float32)

    # fc2: (n_out, 512) -> (512, 128)
    wf2t, bf2t = params["fc2"]
    n_out = wf2t.shape[0]
    assert n_out <= OCP
    wf2m = jnp.pad(wf2t.T, ((0, 0), (0, OCP - n_out))).astype(jnp.bfloat16)
    bf2m = jnp.pad(bf2t, (0, OCP - n_out)).reshape(1, OCP).astype(jnp.float32)

    arrs = dict(w1=w1m, b1=b1m, w2=w2m, b2=b2m, w3=w3m, b3=b3m,
                wf1=wf1m, bf1=bf1m, wf2=wf2m, bf2=bf2m)
    cfg = dict(oh1=oh1, ow1=ow1, oh2=oh2, ow2=ow2, oh3=oh3, ow3=ow3, n_out=n_out)
    return arrs, cfg


# ---------------------------------------------------------------------------
# Forward pass (matches DQN.forward) — one fused pallas_call.
# ---------------------------------------------------------------------------
def dqn_forward(arrs, x, cfg):
    """x: (B, C, H, W) float -> (B, n_out) float32."""
    B, c_in = x.shape[0], x.shape[1]
    oh1, ow1 = cfg["oh1"], cfg["ow1"]
    oh2, ow2, oh3, ow3 = cfg["oh2"], cfg["ow2"], cfg["oh3"], cfg["ow3"]
    m1, k1 = oh1 * ow1, 8 * 8 * c_in
    np3 = oh3 * ow3

    # 2-way grid over batch chunks when possible (both v7x TensorCores busy);
    # otherwise one block with the whole batch folded into M.
    G = 2 if (B % 2 == 0 and ((B // 2) * m1) % 8 == 0) else 1
    bc = B // G

    x_pat = _conv1_patches(x, oh1, ow1)                       # (B*m1, k1) bf16

    w1, b1, w2, b2, w3, b3 = (arrs[k] for k in ("w1", "b1", "w2", "b2", "w3", "b3"))
    wf1, bf1, wf2, bf2 = (arrs[k] for k in ("wf1", "bf1", "wf2", "bf2"))
    hdim = wf1.shape[-1]

    flops = 2 * B * (m1 * k1 * OCP + oh2 * ow2 * 16 * OCP * OCP
                     + np3 * 9 * OCP * OCP + np3 * OCP * hdim + hdim * OCP)
    bytes_accessed = (x_pat.size + w1.size + w2.size + w3.size
                      + wf1.size + wf2.size) * 2 + \
        (b1.size + b2.size + b3.size + bf1.size + bf2.size + B * OCP) * 4

    kernel = functools.partial(_dqn_kernel, bc=bc, oh1=oh1, ow1=ow1,
                               oh2=oh2, ow2=ow2, oh3=oh3, ow3=ow3)
    out = pl.pallas_call(
        kernel,
        out_shape=jax.ShapeDtypeStruct((G, bc, OCP), jnp.float32),
        grid=(G,),
        in_specs=[
            pl.BlockSpec((bc * m1, k1), lambda g: (g, 0)),
            pl.BlockSpec(w1.shape, lambda g: (0, 0)),          # resident weights
            pl.BlockSpec(b1.shape, lambda g: (0, 0)),
            pl.BlockSpec(w2.shape, lambda g: (0, 0)),
            pl.BlockSpec(b2.shape, lambda g: (0, 0)),
            pl.BlockSpec(w3.shape, lambda g: (0, 0)),
            pl.BlockSpec(b3.shape, lambda g: (0, 0)),
            pl.BlockSpec(wf1.shape, lambda g: (0, 0, 0)),
            pl.BlockSpec(bf1.shape, lambda g: (0, 0)),
            pl.BlockSpec(wf2.shape, lambda g: (0, 0)),
            pl.BlockSpec(bf2.shape, lambda g: (0, 0)),
        ],
        out_specs=pl.BlockSpec((None, bc, OCP), lambda g: (g, 0, 0)),
        compiler_params=pltpu.CompilerParams(
            dimension_semantics=("parallel",)),
        cost_estimate=pl.CostEstimate(flops=int(flops), transcendentals=0,
                                      bytes_accessed=int(bytes_accessed)),
    )(x_pat, w1, b1, w2, b2, w3, b3, wf1, bf1, wf2, bf2)
    return out.reshape(B, OCP)[:, :cfg["n_out"]]


# ---------------------------------------------------------------------------
# Pure-JAX reference (same bf16-in / f32-accumulate rounding points).
# ---------------------------------------------------------------------------
def reference_forward(params, x):
    h = x.astype(jnp.float32)
    for (wgt, bias, s) in params["conv"]:
        h = jax.lax.conv_general_dilated(
            h.astype(jnp.bfloat16), wgt.astype(jnp.bfloat16),
            window_strides=(s, s), padding="VALID",
            dimension_numbers=("NCHW", "OIHW", "NCHW"),
            preferred_element_type=jnp.float32)
        h = jnp.maximum(h + bias.reshape(1, -1, 1, 1), 0.0)
    flat = h.reshape(h.shape[0], -1).astype(jnp.bfloat16)
    w1, b1 = params["fc1"]
    w2, b2 = params["fc2"]
    z = jnp.dot(flat, w1.T.astype(jnp.bfloat16),
                preferred_element_type=jnp.float32) + b1
    z = jnp.maximum(z, 0.0)
    return jnp.dot(z.astype(jnp.bfloat16), w2.T.astype(jnp.bfloat16),
                   preferred_element_type=jnp.float32) + b2


if __name__ == "__main__":
    key = jax.random.PRNGKey(0)
    k_param, k_x = jax.random.split(key)

    # Smallest spatial size the conv stack supports: 36x36 -> 8x8 -> 3x3 -> 1x1.
    n_in = (4, 36, 36)
    n_out = 6
    batch = 2

    params = init_params(k_param, n_in, n_out)
    arrs, cfg = prepare_params(params, n_in)
    x = jax.random.normal(k_x, (batch,) + n_in, dtype=jnp.float32)

    fwd = jax.jit(lambda a, xx: dqn_forward(a, xx, cfg))
    out = jax.block_until_ready(fwd(arrs, x))

    assert out.shape == (batch, n_out), out.shape
    assert out.dtype == jnp.float32

    # Numerical check against the XLA reference (identical bf16 rounding points;
    # differences only from f32 summation order / exact-zero padding).
    ref = jax.block_until_ready(reference_forward(params, x))
    assert jnp.allclose(out, ref, rtol=2e-2, atol=2e-2), \
        f"max abs err {float(jnp.max(jnp.abs(out - ref)))}"

    print("KERNEL_OK")
</pallas_src>

<mosaic_0001>
module attributes {stable_mosaic.version = 11 : i64} {
  func.func @_dqn_kernel(%arg0: i32, %arg1: memref<64x256xbf16, #tpu.memory_space<vmem>>, %arg2: memref<256x128xbf16, #tpu.memory_space<vmem>>, %arg3: memref<1x128xf32, #tpu.memory_space<vmem>>, %arg4: memref<2048x128xbf16, #tpu.memory_space<vmem>>, %arg5: memref<1x128xf32, #tpu.memory_space<vmem>>, %arg6: memref<1152x128xbf16, #tpu.memory_space<vmem>>, %arg7: memref<1x128xf32, #tpu.memory_space<vmem>>, %arg8: memref<1x128x512xbf16, #tpu.memory_space<vmem>>, %arg9: memref<1x512xf32, #tpu.memory_space<vmem>>, %arg10: memref<512x128xbf16, #tpu.memory_space<vmem>>, %arg11: memref<1x128xf32, #tpu.memory_space<vmem>>, %arg12: memref<1x1x128xf32, #tpu.memory_space<vmem>>) attributes {dimension_semantics = [#tpu.dimension_semantics<parallel>], iteration_bounds = array<i64: 2>, scalar_prefetch = 0 : i64, scratch_operands = 0 : i64, tpu.core_type = #tpu.core_type<tc>, window_params = [{transform_indices = @transform_0, window_bounds = array<i64: 64, 256>}, {pipeline_mode = #tpu.pipeline_mode<synchronous>, transform_indices = @transform_1, window_bounds = array<i64: 256, 128>}, {pipeline_mode = #tpu.pipeline_mode<synchronous>, transform_indices = @transform_2, window_bounds = array<i64: 1, 128>}, {pipeline_mode = #tpu.pipeline_mode<synchronous>, transform_indices = @transform_3, window_bounds = array<i64: 2048, 128>}, {pipeline_mode = #tpu.pipeline_mode<synchronous>, transform_indices = @transform_4, window_bounds = array<i64: 1, 128>}, {pipeline_mode = #tpu.pipeline_mode<synchronous>, transform_indices = @transform_5, window_bounds = array<i64: 1152, 128>}, {pipeline_mode = #tpu.pipeline_mode<synchronous>, transform_indices = @transform_6, window_bounds = array<i64: 1, 128>}, {pipeline_mode = #tpu.pipeline_mode<synchronous>, transform_indices = @transform_7, window_bounds = array<i64: 1, 128, 512>}, {pipeline_mode = #tpu.pipeline_mode<synchronous>, transform_indices = @transform_8, window_bounds = array<i64: 1, 512>}, {pipeline_mode = #tpu.pipeline_mode<synchronous>, transform_indices = @transform_9, window_bounds = array<i64: 512, 128>}, {pipeline_mode = #tpu.pipeline_mode<synchronous>, transform_indices = @transform_10, window_bounds = array<i64: 1, 128>}, {transform_indices = @transform_11, window_bounds = array<i64: 1, 1, 128>}]} {
    %c0 = arith.constant 0 : index
    %c0_0 = arith.constant 0 : index
    %0 = vector.load %arg1[%c0, %c0_0] : memref<64x256xbf16, #tpu.memory_space<vmem>>, vector<64x256xbf16>
    %c0_1 = arith.constant 0 : index
    %c0_2 = arith.constant 0 : index
    %1 = vector.load %arg2[%c0_1, %c0_2] : memref<256x128xbf16, #tpu.memory_space<vmem>>, vector<256x128xbf16>
    %cst = arith.constant dense<0.000000e+00> : vector<64x128xf32>
    %2 = tpu.matmul %0, %1, %cst {dimension_numbers = #tpu.dot_dimension_numbers<[1], [0], [0], [1], [0, 0, 1, 1], [], []>} : vector<64x256xbf16>, vector<256x128xbf16>, vector<64x128xf32> -> vector<64x128xf32>
    %c0_3 = arith.constant 0 : index
    %c0_4 = arith.constant 0 : index
    %3 = vector.load %arg3[%c0_3, %c0_4] : memref<1x128xf32, #tpu.memory_space<vmem>>, vector<1x128xf32>
    %4 = vector.broadcast %3 : vector<1x128xf32> to vector<64x128xf32>
    %5 = arith.addf %2, %4 : vector<64x128xf32>
    %cst_5 = arith.constant 0.000000e+00 : f32
    %6 = vector.broadcast %cst_5 : f32 to vector<64x128xf32>
    %7 = arith.maximumf %5, %6 : vector<64x128xf32>
    %8 = vector.extract_strided_slice %7 {offsets = [0, 0], sizes = [3, 128], strides = [1, 1]} : vector<64x128xf32> to vector<3x128xf32>
    %9 = vector.extract_strided_slice %7 {offsets = [4, 0], sizes = [3, 128], strides = [1, 1]} : vector<64x128xf32> to vector<3x128xf32>
    %10 = vector.extract_strided_slice %7 {offsets = [8, 0], sizes = [3, 128], strides = [1, 1]} : vector<64x128xf32> to vector<3x128xf32>
    %11 = tpu.concatenate %8, %9, %10 in 0 : vector<3x128xf32>, vector<3x128xf32>, vector<3x128xf32> -> vector<9x128xf32>
    %12 = vector.extract_strided_slice %7 {offsets = [16, 0], sizes = [3, 128], strides = [1, 1]} : vector<64x128xf32> to vector<3x128xf32>
    %13 = vector.extract_strided_slice %7 {offsets = [20, 0], sizes = [3, 128], strides = [1, 1]} : vector<64x128xf32> to vector<3x128xf32>
    %14 = vector.extract_strided_slice %7 {offsets = [24, 0], sizes = [3, 128], strides = [1, 1]} : vector<64x128xf32> to vector<3x128xf32>
    %15 = tpu.concatenate %12, %13, %14 in 0 : vector<3x128xf32>, vector<3x128xf32>, vector<3x128xf32> -> vector<9x128xf32>
    %16 = vector.extract_strided_slice %7 {offsets = [1, 0], sizes = [3, 128], strides = [1, 1]} : vector<64x128xf32> to vector<3x128xf32>
    %17 = vector.extract_strided_slice %7 {offsets = [5, 0], sizes = [3, 128], strides = [1, 1]} : vector<64x128xf32> to vector<3x128xf32>
    %18 = vector.extract_strided_slice %7 {offsets = [9, 0], sizes = [3, 128], strides = [1, 1]} : vector<64x128xf32> to vector<3x128xf32>
    %19 = tpu.concatenate %16, %17, %18 in 0 : vector<3x128xf32>, vector<3x128xf32>, vector<3x128xf32> -> vector<9x128xf32>
    %20 = vector.extract_strided_slice %7 {offsets = [17, 0], sizes = [3, 128], strides = [1, 1]} : vector<64x128xf32> to vector<3x128xf32>
    %21 = vector.extract_strided_slice %7 {offsets = [21, 0], sizes = [3, 128], strides = [1, 1]} : vector<64x128xf32> to vector<3x128xf32>
    %22 = vector.extract_strided_slice %7 {offsets = [25, 0], sizes = [3, 128], strides = [1, 1]} : vector<64x128xf32> to vector<3x128xf32>
    %23 = tpu.concatenate %20, %21, %22 in 0 : vector<3x128xf32>, vector<3x128xf32>, vector<3x128xf32> -> vector<9x128xf32>
    %24 = vector.extract_strided_slice %7 {offsets = [32, 0], sizes = [3, 128], strides = [1, 1]} : vector<64x128xf32> to vector<3x128xf32>
    %25 = vector.extract_strided_slice %7 {offsets = [36, 0], sizes = [3, 128], strides = [1, 1]} : vector<64x128xf32> to vector<3x128xf32>
    %26 = vector.extract_strided_slice %7 {offsets = [40, 0], sizes = [3, 128], strides = [1, 1]} : vector<64x128xf32> to vector<3x128xf32>
    %27 = tpu.concatenate %24, %25, %26 in 0 : vector<3x128xf32>, vector<3x128xf32>, vector<3x128xf32> -> vector<9x128xf32>
    %28 = vector.extract_strided_slice %7 {offsets = [48, 0], sizes = [3, 128], strides = [1, 1]} : vector<64x128xf32> to vector<3x128xf32>
    %29 = vector.extract_strided_slice %7 {offsets = [52, 0], sizes = [3, 128], strides = [1, 1]} : vector<64x128xf32> to vector<3x128xf32>
    %30 = vector.extract_strided_slice %7 {offsets = [56, 0], sizes = [3, 128], strides = [1, 1]} : vector<64x128xf32> to vector<3x128xf32>
    %31 = tpu.concatenate %28, %29, %30 in 0 : vector<3x128xf32>, vector<3x128xf32>, vector<3x128xf32> -> vector<9x128xf32>
    %32 = vector.extract_strided_slice %7 {offsets = [33, 0], sizes = [3, 128], strides = [1, 1]} : vector<64x128xf32> to vector<3x128xf32>
    %33 = vector.extract_strided_slice %7 {offsets = [37, 0], sizes = [3, 128], strides = [1, 1]} : vector<64x128xf32> to vector<3x128xf32>
    %34 = vector.extract_strided_slice %7 {offsets = [41, 0], sizes = [3, 128], strides = [1, 1]} : vector<64x128xf32> to vector<3x128xf32>
    %35 = tpu.concatenate %32, %33, %34 in 0 : vector<3x128xf32>, vector<3x128xf32>, vector<3x128xf32> -> vector<9x128xf32>
    %36 = vector.extract_strided_slice %7 {offsets = [49, 0], sizes = [3, 128], strides = [1, 1]} : vector<64x128xf32> to vector<3x128xf32>
    %37 = vector.extract_strided_slice %7 {offsets = [53, 0], sizes = [3, 128], strides = [1, 1]} : vector<64x128xf32> to vector<3x128xf32>
    %38 = vector.extract_strided_slice %7 {offsets = [57, 0], sizes = [3, 128], strides = [1, 1]} : vector<64x128xf32> to vector<3x128xf32>
    %39 = tpu.concatenate %36, %37, %38 in 0 : vector<3x128xf32>, vector<3x128xf32>, vector<3x128xf32> -> vector<9x128xf32>
    %40 = vector.extract_strided_slice %7 {offsets = [4, 0], sizes = [3, 128], strides = [1, 1]} : vector<64x128xf32> to vector<3x128xf32>
    %41 = vector.extract_strided_slice %7 {offsets = [8, 0], sizes = [3, 128], strides = [1, 1]} : vector<64x128xf32> to vector<3x128xf32>
    %42 = vector.extract_strided_slice %7 {offsets = [12, 0], sizes = [3, 128], strides = [1, 1]} : vector<64x128xf32> to vector<3x128xf32>
    %43 = tpu.concatenate %40, %41, %42 in 0 : vector<3x128xf32>, vector<3x128xf32>, vector<3x128xf32> -> vector<9x128xf32>
    %44 = vector.extract_strided_slice %7 {offsets = [20, 0], sizes = [3, 128], strides = [1, 1]} : vector<64x128xf32> to vector<3x128xf32>
    %45 = vector.extract_strided_slice %7 {offsets = [24, 0], sizes = [3, 128], strides = [1, 1]} : vector<64x128xf32> to vector<3x128xf32>
    %46 = vector.extract_strided_slice %7 {offsets = [28, 0], sizes = [3, 128], strides = [1, 1]} : vector<64x128xf32> to vector<3x128xf32>
    %47 = tpu.concatenate %44, %45, %46 in 0 : vector<3x128xf32>, vector<3x128xf32>, vector<3x128xf32> -> vector<9x128xf32>
    %48 = vector.extract_strided_slice %7 {offsets = [5, 0], sizes = [3, 128], strides = [1, 1]} : vector<64x128xf32> to vector<3x128xf32>
    %49 = vector.extract_strided_slice %7 {offsets = [9, 0], sizes = [3, 128], strides = [1, 1]} : vector<64x128xf32> to vector<3x128xf32>
    %50 = vector.extract_strided_slice %7 {offsets = [13, 0], sizes = [3, 128], strides = [1, 1]} : vector<64x128xf32> to vector<3x128xf32>
    %51 = tpu.concatenate %48, %49, %50 in 0 : vector<3x128xf32>, vector<3x128xf32>, vector<3x128xf32> -> vector<9x128xf32>
    %52 = vector.extract_strided_slice %7 {offsets = [21, 0], sizes = [3, 128], strides = [1, 1]} : vector<64x128xf32> to vector<3x128xf32>
    %53 = vector.extract_strided_slice %7 {offsets = [25, 0], sizes = [3, 128], strides = [1, 1]} : vector<64x128xf32> to vector<3x128xf32>
    %54 = vector.extract_strided_slice %7 {offsets = [29, 0], sizes = [3, 128], strides = [1, 1]} : vector<64x128xf32> to vector<3x128xf32>
    %55 = tpu.concatenate %52, %53, %54 in 0 : vector<3x128xf32>, vector<3x128xf32>, vector<3x128xf32> -> vector<9x128xf32>
    %56 = vector.extract_strided_slice %7 {offsets = [36, 0], sizes = [3, 128], strides = [1, 1]} : vector<64x128xf32> to vector<3x128xf32>
    %57 = vector.extract_strided_slice %7 {offsets = [40, 0], sizes = [3, 128], strides = [1, 1]} : vector<64x128xf32> to vector<3x128xf32>
    %58 = vector.extract_strided_slice %7 {offsets = [44, 0], sizes = [3, 128], strides = [1, 1]} : vector<64x128xf32> to vector<3x128xf32>
    %59 = tpu.concatenate %56, %57, %58 in 0 : vector<3x128xf32>, vector<3x128xf32>, vector<3x128xf32> -> vector<9x128xf32>
    %60 = vector.extract_strided_slice %7 {offsets = [52, 0], sizes = [3, 128], strides = [1, 1]} : vector<64x128xf32> to vector<3x128xf32>
    %61 = vector.extract_strided_slice %7 {offsets = [56, 0], sizes = [3, 128], strides = [1, 1]} : vector<64x128xf32> to vector<3x128xf32>
    %62 = vector.extract_strided_slice %7 {offsets = [60, 0], sizes = [3, 128], strides = [1, 1]} : vector<64x128xf32> to vector<3x128xf32>
    %63 = tpu.concatenate %60, %61, %62 in 0 : vector<3x128xf32>, vector<3x128xf32>, vector<3x128xf32> -> vector<9x128xf32>
    %64 = vector.extract_strided_slice %7 {offsets = [37, 0], sizes = [3, 128], strides = [1, 1]} : vector<64x128xf32> to vector<3x128xf32>
    %65 = vector.extract_strided_slice %7 {offsets = [41, 0], sizes = [3, 128], strides = [1, 1]} : vector<64x128xf32> to vector<3x128xf32>
    %66 = vector.extract_strided_slice %7 {offsets = [45, 0], sizes = [3, 128], strides = [1, 1]} : vector<64x128xf32> to vector<3x128xf32>
    %67 = tpu.concatenate %64, %65, %66 in 0 : vector<3x128xf32>, vector<3x128xf32>, vector<3x128xf32> -> vector<9x128xf32>
    %68 = vector.extract_strided_slice %7 {offsets = [53, 0], sizes = [3, 128], strides = [1, 1]} : vector<64x128xf32> to vector<3x128xf32>
    %69 = vector.extract_strided_slice %7 {offsets = [57, 0], sizes = [3, 128], strides = [1, 1]} : vector<64x128xf32> to vector<3x128xf32>
    %70 = vector.extract_strided_slice %7 {offsets = [61, 0], sizes = [3, 128], strides = [1, 1]} : vector<64x128xf32> to vector<3x128xf32>
    %71 = tpu.concatenate %68, %69, %70 in 0 : vector<3x128xf32>, vector<3x128xf32>, vector<3x128xf32> -> vector<9x128xf32>
    %72 = tpu.concatenate %11, %15, %19, %23, %27, %31, %35, %39, %43, %47, %51, %55, %59, %63, %67, %71 in 1 : vector<9x128xf32>, vector<9x128xf32>, vector<9x128xf32>, vector<9x128xf32>, vector<9x128xf32>, vector<9x128xf32>, vector<9x128xf32>, vector<9x128xf32>, vector<9x128xf32>, vector<9x128xf32>, vector<9x128xf32>, vector<9x128xf32>, vector<9x128xf32>, vector<9x128xf32>, vector<9x128xf32>, vector<9x128xf32> -> vector<9x2048xf32>
    %73 = arith.truncf %72 : vector<9x2048xf32> to vector<9x2048xbf16>
    %c0_6 = arith.constant 0 : index
    %c0_7 = arith.constant 0 : index
    %74 = vector.load %arg4[%c0_6, %c0_7] : memref<2048x128xbf16, #tpu.memory_space<vmem>>, vector<2048x128xbf16>
    %cst_8 = arith.constant dense<0.000000e+00> : vector<9x128xf32>
    %75 = tpu.matmul %73, %74, %cst_8 {dimension_numbers = #tpu.dot_dimension_numbers<[1], [0], [0], [1], [0, 0, 1, 1], [], []>} : vector<9x2048xbf16>, vector<2048x128xbf16>, vector<9x128xf32> -> vector<9x128xf32>
    %c0_9 = arith.constant 0 : index
    %c0_10 = arith.constant 0 : index
    %76 = vector.load %arg5[%c0_9, %c0_10] : memref<1x128xf32, #tpu.memory_space<vmem>>, vector<1x128xf32>
    %77 = vector.broadcast %76 : vector<1x128xf32> to vector<9x128xf32>
    %78 = arith.addf %75, %77 : vector<9x128xf32>
    %cst_11 = arith.constant 0.000000e+00 : f32
    %79 = vector.broadcast %cst_11 : f32 to vector<9x128xf32>
    %80 = arith.maximumf %78, %79 : vector<9x128xf32>
    %81 = vector.extract_strided_slice %80 {offsets = [0, 0], sizes = [1, 128], strides = [1, 1]} : vector<9x128xf32> to vector<1x128xf32>
    %82 = vector.extract_strided_slice %80 {offsets = [1, 0], sizes = [1, 128], strides = [1, 1]} : vector<9x128xf32> to vector<1x128xf32>
    %83 = vector.extract_strided_slice %80 {offsets = [2, 0], sizes = [1, 128], strides = [1, 1]} : vector<9x128xf32> to vector<1x128xf32>
    %84 = vector.extract_strided_slice %80 {offsets = [3, 0], sizes = [1, 128], strides = [1, 1]} : vector<9x128xf32> to vector<1x128xf32>
    %85 = vector.extract_strided_slice %80 {offsets = [4, 0], sizes = [1, 128], strides = [1, 1]} : vector<9x128xf32> to vector<1x128xf32>
    %86 = vector.extract_strided_slice %80 {offsets = [5, 0], sizes = [1, 128], strides = [1, 1]} : vector<9x128xf32> to vector<1x128xf32>
    %87 = vector.extract_strided_slice %80 {offsets = [6, 0], sizes = [1, 128], strides = [1, 1]} : vector<9x128xf32> to vector<1x128xf32>
    %88 = vector.extract_strided_slice %80 {offsets = [7, 0], sizes = [1, 128], strides = [1, 1]} : vector<9x128xf32> to vector<1x128xf32>
    %89 = vector.extract_strided_slice %80 {offsets = [8, 0], sizes = [1, 128], strides = [1, 1]} : vector<9x128xf32> to vector<1x128xf32>
    %90 = tpu.concatenate %81, %82, %83, %84, %85, %86, %87, %88, %89 in 1 : vector<1x128xf32>, vector<1x128xf32>, vector<1x128xf32>, vector<1x128xf32>, vector<1x128xf32>, vector<1x128xf32>, vector<1x128xf32>, vector<1x128xf32>, vector<1x128xf32> -> vector<1x1152xf32>
    %91 = arith.truncf %90 : vector<1x1152xf32> to vector<1x1152xbf16>
    %c0_12 = arith.constant 0 : index
    %c0_13 = arith.constant 0 : index
    %92 = vector.load %arg6[%c0_12, %c0_13] : memref<1152x128xbf16, #tpu.memory_space<vmem>>, vector<1152x128xbf16>
    %cst_14 = arith.constant dense<0.000000e+00> : vector<1x128xf32>
    %93 = tpu.matmul %91, %92, %cst_14 {dimension_numbers = #tpu.dot_dimension_numbers<[1], [0], [0], [1], [0, 0, 1, 1], [], []>} : vector<1x1152xbf16>, vector<1152x128xbf16>, vector<1x128xf32> -> vector<1x128xf32>
    %c0_15 = arith.constant 0 : index
    %c0_16 = arith.constant 0 : index
    %94 = vector.load %arg7[%c0_15, %c0_16] : memref<1x128xf32, #tpu.memory_space<vmem>>, vector<1x128xf32>
    %95 = arith.addf %93, %94 : vector<1x128xf32>
    %cst_17 = arith.constant 0.000000e+00 : f32
    %96 = vector.broadcast %cst_17 : f32 to vector<1x128xf32>
    %97 = arith.maximumf %95, %96 : vector<1x128xf32>
    %98 = arith.truncf %97 : vector<1x128xf32> to vector<1x128xbf16>
    %c0_18 = arith.constant 0 : index
    %c0_19 = arith.constant 0 : index
    %c0_20 = arith.constant 0 : index
    %99 = vector.load %arg8[%c0_18, %c0_19, %c0_20] : memref<1x128x512xbf16, #tpu.memory_space<vmem>>, vector<1x128x512xbf16>
    %100 = vector.shape_cast %99 : vector<1x128x512xbf16> to vector<128x512xbf16>
    %cst_21 = arith.constant dense<0.000000e+00> : vector<1x512xf32>
    %101 = tpu.matmul %98, %100, %cst_21 {dimension_numbers = #tpu.dot_dimension_numbers<[1], [0], [0], [1], [0, 0, 1, 1], [], []>} : vector<1x128xbf16>, vector<128x512xbf16>, vector<1x512xf32> -> vector<1x512xf32>
    %c0_22 = arith.constant 0 : index
    %c0_23 = arith.constant 0 : index
    %102 = vector.load %arg9[%c0_22, %c0_23] : memref<1x512xf32, #tpu.memory_space<vmem>>, vector<1x512xf32>
    %103 = arith.addf %101, %102 : vector<1x512xf32>
    %cst_24 = arith.constant 0.000000e+00 : f32
    %104 = vector.broadcast %cst_24 : f32 to vector<1x512xf32>
    %105 = arith.maximumf %103, %104 : vector<1x512xf32>
    %106 = arith.truncf %105 : vector<1x512xf32> to vector<1x512xbf16>
    %c0_25 = arith.constant 0 : index
    %c0_26 = arith.constant 0 : index
    %107 = vector.load %arg10[%c0_25, %c0_26] : memref<512x128xbf16, #tpu.memory_space<vmem>>, vector<512x128xbf16>
    %cst_27 = arith.constant dense<0.000000e+00> : vector<1x128xf32>
    %108 = tpu.matmul %106, %107, %cst_27 {dimension_numbers = #tpu.dot_dimension_numbers<[1], [0], [0], [1], [0, 0, 1, 1], [], []>} : vector<1x512xbf16>, vector<512x128xbf16>, vector<1x128xf32> -> vector<1x128xf32>
    %c0_28 = arith.constant 0 : index
    %c0_29 = arith.constant 0 : index
    %109 = vector.load %arg11[%c0_28, %c0_29] : memref<1x128xf32, #tpu.memory_space<vmem>>, vector<1x128xf32>
    %110 = arith.addf %108, %109 : vector<1x128xf32>
    %c0_30 = arith.constant 0 : index
    %c0_31 = arith.constant 0 : index
    %c0_32 = arith.constant 0 : index
    %111 = vector.load %arg12[%c0_30, %c0_31, %c0_32] : memref<1x1x128xf32, #tpu.memory_space<vmem>>, vector<1x1x128xf32>
    %112 = vector.shape_cast %111 : vector<1x1x128xf32> to vector<1x128xf32>
    %113 = vector.shape_cast %110 : vector<1x128xf32> to vector<1x1x128xf32>
    tpu.vector_store %arg12[%c0_30, %c0_31, %c0_32], %113 {strides = array<i32>} : memref<1x1x128xf32, #tpu.memory_space<vmem>>, vector<1x1x128xf32>,
    return
  }
  func.func @transform_0(%arg0: i32) -> (i32, i32) {
    %c0_i32 = arith.constant 0 : i32
    %c0_i32_0 = arith.constant 0 : i32
    return %arg0, %c0_i32 : i32, i32
  }
  func.func @transform_1(%arg0: i32) -> (i32, i32) {
    %c0_i32 = arith.constant 0 : i32
    %c0_i32_0 = arith.constant 0 : i32
    %c0_i32_1 = arith.constant 0 : i32
    return %c0_i32, %c0_i32_0 : i32, i32
  }
  func.func @transform_2(%arg0: i32) -> (i32, i32) {
    %c0_i32 = arith.constant 0 : i32
    %c0_i32_0 = arith.constant 0 : i32
    %c0_i32_1 = arith.constant 0 : i32
    return %c0_i32, %c0_i32_0 : i32, i32
  }
  func.func @transform_3(%arg0: i32) -> (i32, i32) {
    %c0_i32 = arith.constant 0 : i32
    %c0_i32_0 = arith.constant 0 : i32
    %c0_i32_1 = arith.constant 0 : i32
    return %c0_i32, %c0_i32_0 : i32, i32
  }
  func.func @transform_4(%arg0: i32) -> (i32, i32) {
    %c0_i32 = arith.constant 0 : i32
    %c0_i32_0 = arith.constant 0 : i32
    %c0_i32_1 = arith.constant 0 : i32
    return %c0_i32, %c0_i32_0 : i32, i32
  }
  func.func @transform_5(%arg0: i32) -> (i32, i32) {
    %c0_i32 = arith.constant 0 : i32
    %c0_i32_0 = arith.constant 0 : i32
    %c0_i32_1 = arith.constant 0 : i32
    return %c0_i32, %c0_i32_0 : i32, i32
  }
  func.func @transform_6(%arg0: i32) -> (i32, i32) {
    %c0_i32 = arith.constant 0 : i32
    %c0_i32_0 = arith.constant 0 : i32
    %c0_i32_1 = arith.constant 0 : i32
    return %c0_i32, %c0_i32_0 : i32, i32
  }
  func.func @transform_7(%arg0: i32) -> (i32, i32, i32) {
    %c0_i32 = arith.constant 0 : i32
    %c0_i32_0 = arith.constant 0 : i32
    %c0_i32_1 = arith.constant 0 : i32
    %c0_i32_2 = arith.constant 0 : i32
    return %c0_i32, %c0_i32_0, %c0_i32_1 : i32, i32, i32
  }
  func.func @transform_8(%arg0: i32) -> (i32, i32) {
    %c0_i32 = arith.constant 0 : i32
    %c0_i32_0 = arith.constant 0 : i32
    %c0_i32_1 = arith.constant 0 : i32
    return %c0_i32, %c0_i32_0 : i32, i32
  }
  func.func @transform_9(%arg0: i32) -> (i32, i32) {
    %c0_i32 = arith.constant 0 : i32
    %c0_i32_0 = arith.constant 0 : i32
    %c0_i32_1 = arith.constant 0 : i32
    return %c0_i32, %c0_i32_0 : i32, i32
  }
  func.func @transform_10(%arg0: i32) -> (i32, i32) {
    %c0_i32 = arith.constant 0 : i32
    %c0_i32_0 = arith.constant 0 : i32
    %c0_i32_1 = arith.constant 0 : i32
    return %c0_i32, %c0_i32_0 : i32, i32
  }
  func.func @transform_11(%arg0: i32) -> (i32, i32, i32) {
    %c0_i32 = arith.constant 0 : i32
    %c0_i32_0 = arith.constant 0 : i32
    %c0_i32_1 = arith.constant 0 : i32
    return %arg0, %c0_i32, %c0_i32_0 : i32, i32, i32
  }
}

</mosaic_0001>

<bundles_post_ra>
// kernel: _lambda_.1
= control target key start
LH: loop header
LB: loop body
LE: loop exit
PB: predicated region body
PF: predicated region fallthrough
CT: control target
= control target key end

     0   :  { %16 = vsyncpa [#allocation3], 0  ;;  %s6207_s0 = inlined_call_operand.vmem [shape: bf16[128,256], index: 0, kind: input, shape index: {}]   ;;  %s6208_s1 = inlined_call_operand.vmem [shape: bf16[256,128], index: 1, kind: input, shape index: {}]   ;;  %s6209_s2 = inlined_call_operand.vmem [shape: f32[1,128], index: 2, kind: input, shape index: {}]   ;;  %s6210_s3 = inlined_call_operand.vmem [shape: bf16[2048,128], index: 3, kind: input, shape index: {}]   ;;  %s6211_s4 = inlined_call_operand.vmem [shape: f32[1,128], index: 4, kind: input, shape index: {}]   ;;  %s6212_s5 = inlined_call_operand.vmem [shape: bf16[1152,128], index: 5, kind: input, shape index: {}]   ;;  %s6213_s6 = inlined_call_operand.vmem [shape: f32[1,128], index: 6, kind: input, shape index: {}]   ;;  %s6214_s7 = inlined_call_operand.vmem [shape: bf16[1,128,512], index: 7, kind: input, shape index: {}]   ;;  %s6215_s8 = inlined_call_operand.vmem [shape: f32[1,512], index: 8, kind: input, shape index: {}]   ;;  %s6216_s9 = inlined_call_operand.vmem [shape: bf16[512,128], index: 9, kind: input, shape index: {}]   ;;  %s6217_s10 = inlined_call_operand.vmem [shape: f32[1,128], index: 10, kind: input, shape index: {}]   ;;  %s6218_s11 = inlined_call_operand.hbm [shape: f32[2,1,128], index: 11, kind: output, shape index: {}]  }
   0x1   :  { %18 = vsyncpa [#allocation3 + $0x1], 0  ;;  %s4994_s17 = smov 0   ;;  %s4996_s18 = smov 0  }
   0x2   :  { %s4998_s19 = smov 0   ;;  %s5000_s20 = smov 0  }
   0x3 LB: > { %6222 = sst [smem:[#allocation5_spill]] %s4928_s19  ;;  %s5015_s21 = sadd.s32 4294967295, %s4932_s20   ;;  %s4932_s20 = sphi %s5000_s20, %s6227_s20   ;;  %s4928_s19 = sphi %s4998_s19, %s6229_s19   ;;  %s4924_s18 = sphi %s4996_s18, %s6231_s18   ;;  %s4920_s17 = sphi %s4994_s17, %s6230_s17  }
   0x4   : > { %s3379_s22 = sadd.s32 4294967294, %s4932_s20   ;;  %s5019_s23 = sadd.s32 1, %s4932_s20  }
   0x5   : > { %6223 = sst [smem:[#allocation6_spill]] %s5019_s23  ;;  %s267_s24 = sadd.s32 1, %s4928_s19 }
   0x6   : > { %s264_s25 = ssub.s32 %s4932_s20, %s5019_s23  ;;  %p277_p0 = scmp.ne.s32.totalorder %s4928_s19, %s4924_s18 }
   0x7   : > { %p265_p1 = scmp.eq.s32.totalorder %s264_s25, 0  ;;  %p278_p2 = scmp.eq.s32.totalorder %s5015_s21, 1 }
   0x8   : > { %p283_p3 = scmp.ne.s32.totalorder %s4924_s18, %s4920_s17  ;;  %p284_p4 = scmp.eq.s32.totalorder %s3379_s22, 1 }
   0x9   : > { %s5030_s26 = scalar_select %p265_p1, %s4928_s19, %s267_s24  }
   0xa   : > { %p5032_p5 = por %p278_p2, %p277_p0  ;;  %p5036_p6 = por %p284_p4, %p283_p3 }
   0xb   : > { %6224 = sst [smem:[#allocation7_spill]] %s5030_s26  ;;  %p3382_p7 = scmp.ge.s32.totalorder %s4932_s20, 1 }
   0xc   : > { %p342_p8 = scmp.lt.s32.totalorder %s4932_s20, 3 }
   0xe   : > { %p343_p9 = pnand %p3382_p7, %p342_p8 }
   0xf   : > { %s3383_s12 = sshll.u32 (!%p343_p9), %s5015_s21, 3  ;;  %s380_s24 = sand.u32 (!%p343_p9), 1, %s4924_s18  }
  0x10   : > { %346 = sbr.rel (%p343_p9) target bundleno = 892 (0x37c), region = 64  ;;  %p383_p10 = scmp.lt.s32.totalorder (!%p343_p9), %s3383_s12, 15 }
  0x11   : > { %s3320_s13 = scalar_lea.hbm (!%p343_p9), %s6218_s11, %s5015_s21  ;;  %s3312_s19 = scalar_lea.sflag (!%p343_p9), [#allocation3], %s380_s24 }
  0x15   : > { %v4556_v0 = vld [vmem:[%s6208_s1 + $0x38] sm:$0xff]  ;;  %v4555_v2 = vld [vmem:[%s6208_s1 + $0x30] sm:$0xff]  ;;  %v4554_v4 = vld [vmem:[%s6208_s1 + $0x28] sm:$0xff]  ;;  %s6233_s12 = smov (!%p383_p10, %s3383_s12), 15  ;;  %vm641_vm0 = vcmask 1042432   ;;  %vm643_vm1 = vcmask 1045504  }
  0x16   : > { %v4564_v1 = vld [vmem:[%s6208_s1 + $0x78] sm:$0xff]  ;;  %569 = vmatpush.bf16.msra.mxu0 %v4556_v0  ;;  %v4563_v3 = vld [vmem:[%s6208_s1 + $0x70] sm:$0xff]  ;;  %v4562_v5 = vld [vmem:[%s6208_s1 + $0x68] sm:$0xff]  ;;  %s4540_s16 = sshll.u32 %s6233_s12, 3  ;;  %s381_s12 = scalar_lea.vmem [#allocation2], %s380_s24 }
  0x17   : > { %598 = vmatpush.bf16.msra.mxu1 %v4564_v1  ;;  %v4553_v6 = vld [vmem:[%s6208_s1 + $0x20] sm:$0xff]  ;;  %v4552_v8 = vld [vmem:[%s6208_s1 + $0x18] sm:$0xff]  ;;  %v4551_v10 = vld [vmem:[%s6208_s1 + $0x10] sm:$0xff]  ;;  %s5088_s30 = scalar_lea.vmem %s6207_s0, %s4540_s16  ;;  %s3322_s14 = sshll.u32 %s381_s12, 4  ;;  %s3323_s14 = int_to_ptr.vmem [resolvable:$true] %s3322_s14 }
  0x18   : > { %v4561_v7 = vld [vmem:[%s6208_s1 + $0x60] sm:$0xff]  ;;  %v4560_v9 = vld [vmem:[%s6208_s1 + $0x58] sm:$0xff]  ;;  %v4559_v11 = vld [vmem:[%s6208_s1 + $0x50] sm:$0xff]  ;;  %s4890_s16 = scalar_lea.hbm %s6218_s11, 2 }
  0x19   : > { %v4550_v12 = vld [vmem:[%s6208_s1 + $0x8] sm:$0xff]  ;;  %v4549_v14 = vld [vmem:[%s6208_s1] sm:$0xff]  ;;  %v3396_v22 = vld [vmem:[%s5088_s30 + $0x10] sm:$0xf] }
  0x1a   : > { %570 = vmatpush.bf16.msra.mxu0 %v4555_v2  ;;  %v4558_v13 = vld [vmem:[%s6208_s1 + $0x48] sm:$0xff]  ;;  %v4557_v15 = vld [vmem:[%s6208_s1 + $0x40] sm:$0xff]  ;;  %v4544_v23 = vld [vmem:[%s5088_s30 + $0x14] sm:$0xf0] }
  0x1b   : > { %599 = vmatpush.bf16.msra.mxu1 %v4563_v3  ;;  %v3388_v16 = vld [vmem:[%s5088_s30] sm:$0xf]  ;;  %v4542_v17 = vld [vmem:[%s5088_s30 + $0x4] sm:$0xf0]  ;;  %v4541_v18 = vld [vmem:[%s5088_s30 + $0x4] sm:$0xf]  ;;  %v3397_v26 = vor.u32 %v4544_v23, %v3396_v22 }
  0x1c   : > { %v3390_v19 = vld [vmem:[%s5088_s30 + $0x8] sm:$0xf0]  ;;  %v3389_v20 = vor.u32 %v4542_v17, %v3388_v16  ;;  %v4543_v24 = vld [vmem:[%s5088_s30 + $0x14] sm:$0xf]  ;;  %v3398_v25 = vld [vmem:[%s5088_s30 + $0x18] sm:$0xf0] }
  0x1d   : > { %v3393_v21 = vor.u32 %v4541_v18, %v3390_v19  ;;  %v3401_v27 = vor.u32 %v4543_v24, %v3398_v25  ;;  %v4572_v28 = vld [vmem:[%s6210_s3 + $0x38] sm:$0xff]  ;;  %v4571_v30 = vld [vmem:[%s6210_s3 + $0x30] sm:$0xff]  ;;  %v4570_v33 = vld [vmem:[%s6210_s3 + $0x28] sm:$0xff] }
  0x1e   : > { %571 = vmatpush.bf16.msra.mxu0 %v4554_v4  ;;  %v4580_v29 = vld [vmem:[%s6210_s3 + $0x78] sm:$0xff]  ;;  %1793 = vmatpush.bf16.msra.mxu2 %v4572_v28  ;;  %v4579_v31 = vld [vmem:[%s6210_s3 + $0x70] sm:$0xff]  ;;  %v4578_v34 = vld [vmem:[%s6210_s3 + $0x68] sm:$0xff] }
  0x1f   : > { %600 = vmatpush.bf16.msra.mxu1 %v4562_v5  ;;  %1807 = vmatpush.bf16.msra.mxu3 %v4580_v29  ;;  %v4604_v32 = vld [vmem:[%s6210_s3 + $0x138] sm:$0xff]  ;;  %v4603_v35 = vld [vmem:[%s6210_s3 + $0x130] sm:$0xff]  ;;  %v3404_v36 = vld [vmem:[%s5088_s30 + $0x20] sm:$0xf] }
  0x20   : > { %v4546_v37 = vld [vmem:[%s5088_s30 + $0x24] sm:$0xf0]  ;;  %v4545_v38 = vld [vmem:[%s5088_s30 + $0x24] sm:$0xf]  ;;  %v3406_v39 = vld [vmem:[%s5088_s30 + $0x28] sm:$0xf0] }
  0x21   : > { %v4569_v40 = vld [vmem:[%s6210_s3 + $0x20] sm:$0xff]  ;;  %v3405_v42 = vor.u32 %v4546_v37, %v3404_v36  ;;  %v3409_v43 = vor.u32 %v4545_v38, %v3406_v39  ;;  %v4568_v44 = vld [vmem:[%s6210_s3 + $0x18] sm:$0xff]  ;;  %v4567_v46 = vld [vmem:[%s6210_s3 + $0x10] sm:$0xff] }
  0x22   : > { %572 = vmatpush.bf16.msra.mxu0 %v4553_v6  ;;  %1794 = vmatpush.bf16.msra.mxu2 %v4571_v30  ;;  %v4577_v41 = vld [vmem:[%s6210_s3 + $0x60] sm:$0xff]  ;;  %v4576_v45 = vld [vmem:[%s6210_s3 + $0x58] sm:$0xff]  ;;  %v4575_v47 = vld [vmem:[%s6210_s3 + $0x50] sm:$0xff] }
  0x23   : > { %601 = vmatpush.bf16.msra.mxu1 %v4561_v7  ;;  %1808 = vmatpush.bf16.msra.mxu3 %v4579_v31  ;;  %v4566_v48 = vld [vmem:[%s6210_s3 + $0x8] sm:$0xff]  ;;  %v3412_v49 = vld [vmem:[%s5088_s30 + $0x30] sm:$0xf]  ;;  %v4548_v50 = vld [vmem:[%s5088_s30 + $0x34] sm:$0xf0] }
  0x24   : > { %v4547_v51 = vld [vmem:[%s5088_s30 + $0x34] sm:$0xf]  ;;  %v3414_v52 = vld [vmem:[%s5088_s30 + $0x38] sm:$0xf0]  ;;  %v4565_v53 = vld [vmem:[%s6210_s3] sm:$0xff]  ;;  %v3413_v55 = vor.u32 %v4548_v50, %v3412_v49  ;;  %s3324_s30 = sshll.u32 %s3320_s13, 4  ;;  %s3325_s30 = int_to_ptr.hbm [resolvable:$true] %s3324_s30 }
  0x25   : > { %v4588_v54 = vld [vmem:[%s6210_s3 + $0xb8] sm:$0xff]  ;;  %v3417_v56 = vor.u32 %v4547_v51, %v3414_v52  ;;  %v4587_v57 = vld [vmem:[%s6210_s3 + $0xb0] sm:$0xff]  ;;  %v4586_v58 = vld [vmem:[%s6210_s3 + $0xa8] sm:$0xff]  ;;  %s4884_s23 = sshra.s32 %s3325_s30, 4  ;;  %s4885_s23 = int_to_ptr.hbm [resolvable:$true] %s4884_s23 }
  0x26   : > { %573 = vmatpush.bf16.msra.mxu0 %v4552_v8  ;;  %1795 = vmatpush.bf16.msra.mxu2 %v4570_v33  ;;  %v4574_v59 = vld [vmem:[%s6210_s3 + $0x48] sm:$0xff]  ;;  %v4585_v60 = vld [vmem:[%s6210_s3 + $0xa0] sm:$0xff]  ;;  %v4584_v63 = vld [vmem:[%s6210_s3 + $0x98] sm:$0xff]  ;;  %s4886_s26 = scalar_lea.hbm %s4885_s23, 1  ;;  %p4891_p0 = scmp.lt.s32.totalorder %s4885_s23, %s6218_s11 }
  0x27   : > { %602 = vmatpush.bf16.msra.mxu1 %v4560_v9  ;;  %1809 = vmatpush.bf16.msra.mxu3 %v4578_v34  ;;  %v4602_v61 = vld [vmem:[%s6210_s3 + $0x128] sm:$0xff]  ;;  %v4573_v62 = vld [vmem:[%s6210_s3 + $0x40] sm:$0xff]  ;;  %v4596_v0 = vld [vmem:[%s6210_s3 + $0xf8] sm:$0xff]  ;;  %p4887_p11 = scmp.ne.s32.totalorder %s4885_s23, %s4886_s26  ;;  %p4892_p1 = scmp.lt.s32.totalorder %s4890_s16, %s4886_s26 }
  0x28   : > { %v4601_v1 = vld [vmem:[%s6210_s3 + $0x120] sm:$0xff]  ;;  %v4583_v2 = vld [vmem:[%s6210_s3 + $0x90] sm:$0xff]  ;;  %v4600_v4 = vld [vmem:[%s6210_s3 + $0x118] sm:$0xff] }
  0x29   : > { %v4595_v3 = vld [vmem:[%s6210_s3 + $0xf0] sm:$0xff]  ;;  %v4612_v5 = vld [vmem:[%s6210_s3 + $0x178] sm:$0xff]  ;;  %v4582_v6 = vld [vmem:[%s6210_s3 + $0x88] sm:$0xff]  ;;  %p4888_p12 = pnand %p4887_p11, %p5032_p5  ;;  %p4893_p2 = por %p4892_p1, %p4891_p0 }
  0x2a   : > { %574 = vmatpush.bf16.msra.mxu0 %v4551_v10  ;;  %1796 = vmatpush.bf16.msra.mxu2 %v4569_v40  ;;  %v4594_v7 = vld [vmem:[%s6210_s3 + $0xe8] sm:$0xff]  ;;  %v4599_v8 = vld [vmem:[%s6210_s3 + $0x110] sm:$0xff]  ;;  %v4581_v10 = vld [vmem:[%s6210_s3 + $0x80] sm:$0xff] }
  0x2b   : > { %603 = vmatpush.bf16.msra.mxu1 %v4559_v11  ;;  %1810 = vmatpush.bf16.msra.mxu3 %v4577_v41  ;;  %v4611_v9 = vld [vmem:[%s6210_s3 + $0x170] sm:$0xff]  ;;  %v4593_v11 = vld [vmem:[%s6210_s3 + $0xe0] sm:$0xff]  ;;  %v4636_v17 = vld [vmem:[%s6210_s3 + $0x238] sm:$0xff]  ;;  %p4889_p13 = pneg %p4888_p12 }
  0x2c   : > { %v4609_v16 = vld [vmem:[%s6210_s3 + $0x160] sm:$0xff]  ;;  %v4591_v18 = vld [vmem:[%s6210_s3 + $0xd0] sm:$0xff]  ;;  %v4608_v19 = vld [vmem:[%s6210_s3 + $0x158] sm:$0xff] }
  0x2d   : > { %v4590_v22 = vld [vmem:[%s6210_s3 + $0xc8] sm:$0xff]  ;;  %v4607_v23 = vld [vmem:[%s6210_s3 + $0x150] sm:$0xff]  ;;  %v4589_v28 = vld [vmem:[%s6210_s3 + $0xc0] sm:$0xff]  ;;  %p4894_p3 = pnand %p4893_p2, %p4889_p13 }
  0x2e   : > { %575 = vmatpush.bf16.msra.mxu0 %v4550_v12  ;;  %1797 = vmatpush.bf16.msra.mxu2 %v4568_v44  ;;  %v4598_v12 = vld [vmem:[%s6210_s3 + $0x108] sm:$0xff]  ;;  %v4633_v30 = vld [vmem:[%s6210_s3 + $0x220] sm:$0xff]  ;;  %v4632_v36 = vld [vmem:[%s6210_s3 + $0x218] sm:$0xff] }
  0x2f   : > { %604 = vmatpush.bf16.msra.mxu1 %v4558_v13  ;;  %1811 = vmatpush.bf16.msra.mxu3 %v4576_v45  ;;  %v4610_v13 = vld [vmem:[%s6210_s3 + $0x168] sm:$0xff]  ;;  %v4644_v37 = vld [vmem:[%s6210_s3 + $0x278] sm:$0xff]  ;;  %v4631_v40 = vld [vmem:[%s6210_s3 + $0x210] sm:$0xff] }
  0x30   : > { %v4634_v24 = vld [vmem:[%s6210_s3 + $0x228] sm:$0xff]  ;;  %v4620_v52 = vld [vmem:[%s6210_s3 + $0x1b8] sm:$0xff] }
  0x31   : > { %v4606_v29 = vld [vmem:[%s6210_s3 + $0x148] sm:$0xff] }
  0x32   : > { %576 = vmatpush.bf16.msra.mxu0 %v4549_v14  ;;  %1798 = vmatpush.bf16.msra.mxu2 %v4567_v46  ;;  %v4592_v14 = vld [vmem:[%s6210_s3 + $0xd8] sm:$0xff]  ;;  %v4630_v45 = vld [vmem:[%s6210_s3 + $0x208] sm:$0xff] }
  0x33   : > { %605 = vmatpush.bf16.msra.mxu1 %v4557_v15  ;;  %1812 = vmatpush.bf16.msra.mxu3 %v4575_v47  ;;  %v4597_v15 = vld [vmem:[%s6210_s3 + $0x100] sm:$0xff]  ;;  %v4642_v49 = vld [vmem:[%s6210_s3 + $0x268] sm:$0xff] }
  0x35   : > { %577 = vmatmul.bf16.vlgmr.msra.gmra.mxu0 %v3389_v20  ;;  %v4635_v20 = vld [vmem:[%s6210_s3 + $0x230] sm:$0xff] }
  0x36   : > { %606 = vmatmul.bf16.vlgmr.msra.gmra.mxu1 %v3393_v21  ;;  %1849 = vmatpush.bf16.msrb.mxu0 %v4604_v32  ;;  %v5250_v21 = vld [vmem:[%s6209_s2] ss:$0 sm:$0xff] }
  0x37   : > { %1799 = vmatpush.bf16.msra.mxu2 %v4566_v48  ;;  %1813 = vmatpush.bf16.msra.mxu3 %v4574_v59  ;;  %v4605_v32 = vld [vmem:[%s6210_s3 + $0x140] sm:$0xff] }
  0x38   : > { %1863 = vmatpush.bf16.msrb.mxu1 %v4612_v5 }
  0x3a   : > { %1850 = vmatpush.bf16.msrb.mxu0 %v4603_v35 }
  0x3b   : > { %1800 = vmatpush.bf16.msra.mxu2 %v4565_v53  ;;  %1814 = vmatpush.bf16.msra.mxu3 %v4573_v62 }
  0x3c   : > { %1864 = vmatpush.bf16.msrb.mxu1 %v4611_v9 }
  0x3e   : > { %1851 = vmatpush.bf16.msrb.mxu0 %v4602_v61 }
  0x3f   : > { %1821 = vmatpush.bf16.msrb.mxu2 %v4588_v54  ;;  %1835 = vmatpush.bf16.msrb.mxu3 %v4596_v0  ;;  %v4629_v54 = vld [vmem:[%s6210_s3 + $0x200] sm:$0xff] }
  0x40   : > { %1865 = vmatpush.bf16.msrb.mxu1 %v4610_v13 }
  0x42   : > { %1852 = vmatpush.bf16.msrb.mxu0 %v4601_v1 }
  0x43   : > { %1822 = vmatpush.bf16.msrb.mxu2 %v4587_v57  ;;  %1836 = vmatpush.bf16.msrb.mxu3 %v4595_v3  ;;  %v4619_v57 = vld [vmem:[%s6210_s3 + $0x1b0] sm:$0xff] }
  0x44   : > { %1866 = vmatpush.bf16.msrb.mxu1 %v4609_v16  ;;  %v4639_v3 = vld [vmem:[%s6210_s3 + $0x250] sm:$0xff] }
  0x45   : > { %582 = vmatmul.bf16.gmra.mxu0 %v3397_v26 }
  0x46   : > { %611 = vmatmul.bf16.gmra.mxu1 %v3401_v27  ;;  %1853 = vmatpush.bf16.msrb.mxu0 %v4600_v4 }
  0x47   : > { %1823 = vmatpush.bf16.msrb.mxu2 %v4586_v58  ;;  %1837 = vmatpush.bf16.msrb.mxu3 %v4594_v7  ;;  %v4640_v58 = vld [vmem:[%s6210_s3 + $0x258] sm:$0xff] }
  0x48   : > { %1867 = vmatpush.bf16.msrb.mxu1 %v4608_v19 }
  0x4a   : > { %1854 = vmatpush.bf16.msrb.mxu0 %v4599_v8 }
  0x4b   : > { %1824 = vmatpush.bf16.msrb.mxu2 %v4585_v60  ;;  %1838 = vmatpush.bf16.msrb.mxu3 %v4593_v11 }
  0x4c   : > { %1868 = vmatpush.bf16.msrb.mxu1 %v4607_v23  ;;  %v4628_v23 = vld [vmem:[%s6210_s3 + $0x1f8] sm:$0xff] }
  0x4e   : > { %1855 = vmatpush.bf16.msrb.mxu0 %v4598_v12  ;;  %v4638_v12 = vld [vmem:[%s6210_s3 + $0x248] sm:$0xff] }
  0x4f   : > { %1825 = vmatpush.bf16.msrb.mxu2 %v4584_v63  ;;  %1839 = vmatpush.bf16.msrb.mxu3 %v4592_v14  ;;  %v4618_v63 = vld [vmem:[%s6210_s3 + $0x1a8] sm:$0xff] }
  0x50   : > { %1869 = vmatpush.bf16.msrb.mxu1 %v4606_v29 }
  0x52   : > { %1856 = vmatpush.bf16.msrb.mxu0 %v4597_v15 }
  0x53   : > { %1826 = vmatpush.bf16.msrb.mxu2 %v4583_v2  ;;  %1840 = vmatpush.bf16.msrb.mxu3 %v4591_v18 }
  0x54   : > { %1870 = vmatpush.bf16.msrb.mxu1 %v4605_v32  ;;  %v4615_v32 = vld [vmem:[%s6210_s3 + $0x190] sm:$0xff] }
  0x55   : > { %587 = vmatmul.bf16.gmra.mxu0 %v3405_v42  ;;  %v4643_v42 = vld [vmem:[%s6210_s3 + $0x270] sm:$0xff] }
  0x56   : > { %616 = vmatmul.bf16.gmra.mxu1 %v3409_v43  ;;  %1905 = vmatpush.bf16.msra.mxu0 %v4636_v17 }
  0x57   : > { %1827 = vmatpush.bf16.msrb.mxu2 %v4582_v6  ;;  %1841 = vmatpush.bf16.msrb.mxu3 %v4590_v22  ;;  %v4617_v6 = vld [vmem:[%s6210_s3 + $0x1a0] sm:$0xff]  ;;  %v4616_v22 = vld [vmem:[%s6210_s3 + $0x198] sm:$0xff] }
  0x58   : > { %1919 = vmatpush.bf16.msra.mxu1 %v4644_v37 }
  0x5a   : > { %1906 = vmatpush.bf16.msra.mxu0 %v4635_v20 }
  0x5b   : > { %1828 = vmatpush.bf16.msrb.mxu2 %v4581_v10  ;;  %1842 = vmatpush.bf16.msrb.mxu3 %v4589_v28 }
  0x5c   : > { %1920 = vmatpush.bf16.msra.mxu1 %v4643_v42 }
  0x5e   : > { %1907 = vmatpush.bf16.msra.mxu0 %v4634_v24 }
  0x60   : > { %1921 = vmatpush.bf16.msra.mxu1 %v4642_v49  ;;  %v4613_v49 = vld [vmem:[%s6210_s3 + $0x180] sm:$0xff] }
  0x62   : > { %1908 = vmatpush.bf16.msra.mxu0 %v4633_v30  ;;  %v4637_v30 = vld [vmem:[%s6210_s3 + $0x240] sm:$0xff] }
  0x65   : > { %592 = vmatmul.bf16.gmra.mxu0 %v3413_v55  ;;  %v4641_v55 = vld [vmem:[%s6210_s3 + $0x260] sm:$0xff] }
  0x66   : > { %621 = vmatmul.bf16.gmra.mxu1 %v3417_v56  ;;  %1909 = vmatpush.bf16.msra.mxu0 %v4632_v36 }
  0x67   : > { %1922 = vmatpush.bf16.msra.mxu1 %v4641_v55 }
  0x6a   : > { %1910 = vmatpush.bf16.msra.mxu0 %v4631_v40  ;;  %v4614_v40 = vld [vmem:[%s6210_s3 + $0x188] sm:$0xff] }
  0x6b   : > { %1923 = vmatpush.bf16.msra.mxu1 %v4640_v58 }
  0x6e   : > { %1911 = vmatpush.bf16.msra.mxu0 %v4630_v45 }
  0x6f   : > { %1924 = vmatpush.bf16.msra.mxu1 %v4639_v3  ;;  %v4668_v3 = vld [vmem:[%s6210_s3 + $0x338] sm:$0xff] }
  0x72   : > { %1912 = vmatpush.bf16.msra.mxu0 %v4629_v54  ;;  %v4652_v54 = vld [vmem:[%s6210_s3 + $0x2b8] sm:$0xff] }
  0x73   : > { %1925 = vmatpush.bf16.msra.mxu1 %v4638_v12 }
  0x77   : > { %1926 = vmatpush.bf16.msra.mxu1 %v4637_v30  ;;  %v4649_v30 = vld [vmem:[%s6210_s3 + $0x2a0] sm:$0xff] }
  0xb2   : > { %v578_v25 = vpop.f32.mrf.mxu0 }
  0xb3   : > { %v607_v26 = vpop.f32.mrf.mxu1  ;;  %v579_v27 = vadd.f32 %v5250_v21, %v578_v25 }
  0xb5   : > { %v608_v31 = vadd.f32 %v607_v26, %v579_v27 }
  0xb7   : > { %v5274_v33 = vmax.f32 %v608_v31, 0.0 }
  0xb9   : > { %v636_v41 = vrot.slane %v5274_v33, 1  ;;  %v653_v0 = vrot.slane %v5274_v33, 2 }
  0xba   : > { %v580_v34 = vpop.f32.mrf.mxu0 }
  0xbb   : > { %v609_v35 = vpop.f32.mrf.mxu1  ;;  %v581_v38 = vadd.f32 %v5250_v21, %v580_v34  ;;  %v642_v48 = vsel %vm641_vm0, %v5274_v33, %v636_v41  ;;  %v657_v7 = vsel %vm641_vm0, %v636_v41, %v653_v0  ;;  %v4627_v34 = vld [vmem:[%s6210_s3 + $0x1f0] sm:$0xff]  ;;  %v4626_v41 = vld [vmem:[%s6210_s3 + $0x1e8] sm:$0xff] }
  0xbd   : > { %v610_v39 = vadd.f32 %v609_v35, %v581_v38 }
  0xbf   : > { %v5290_v43 = vmax.f32 %v610_v39, 0.0 }
  0xc1   : > { %v639_v44 = vrot.slane %v5290_v43, 2  ;;  %v655_v1 = vrot.slane %v5290_v43, 3 }
  0xc2   : > { %v583_v46 = vpop.f32.mrf.mxu0 }
  0xc3   : > { %v612_v47 = vpop.f32.mrf.mxu1  ;;  %v584_v50 = vadd.f32 %v5250_v21, %v583_v46  ;;  %v644_v51 = vsel %vm643_vm1, %v642_v48, %v639_v44  ;;  %v658_v8 = vsel %vm643_vm1, %v657_v7, %v655_v1 }
  0xc4   : > { %v749_v53 = vpack.c.bf16 %v639_v44, %v644_v51  ;;  %v751_v26 = vpack.c.bf16 %v655_v1, %v658_v8  ;;  %v4651_v8 = vld [vmem:[%s6210_s3 + $0x2b0] sm:$0xff] }
  0xc5   : > { %v613_v56 = vadd.f32 %v612_v47, %v584_v50  ;;  %v4625_v50 = vld [vmem:[%s6210_s3 + $0x1e0] sm:$0xff] }
  0xc6   : > { %1801 = vmatmul.bf16.vlgmr.msra.gmra.mxu2 %v749_v53 }
  0xc7   : > { %1877 = vmatpush.bf16.msra.mxu2 %v4620_v52  ;;  %v5318_v59 = vmax.f32 %v613_v56, 0.0 }
  0xc9   : > { %v646_v4 = vrot.slane %v5318_v59, 1  ;;  %v701_v9 = vrot.slane %v5318_v59, 4  ;;  %v715_v14 = vrot.slane %v5318_v59, 5  ;;  %v659_v38 = vrot.slane %v5318_v59, 2 }
  0xca   : > { %v585_v60 = vpop.f32.mrf.mxu0 }
  0xcb   : > { %v614_v61 = vpop.f32.mrf.mxu1  ;;  %v586_v62 = vadd.f32 %v5250_v21, %v585_v60  ;;  %1878 = vmatpush.bf16.msra.mxu2 %v4619_v57  ;;  %v651_v17 = vsel %vm641_vm0, %v5318_v59, %v646_v4  ;;  %v663_v47 = vsel %vm641_vm0, %v646_v4, %v659_v38  ;;  %v4621_v38 = vld [vmem:[%s6210_s3 + $0x1c0] sm:$0xff] }
  0xcd   : > { %v615_v2 = vadd.f32 %v614_v61, %v586_v62 }
  0xcf   : > { %v5330_v5 = vmax.f32 %v615_v2, 0.0  ;;  %1879 = vmatpush.bf16.msra.mxu2 %v4618_v63  ;;  %v4624_v2 = vld [vmem:[%s6210_s3 + $0x1d8] sm:$0xff] }
  0xd1   : > { %v703_v10 = vrot.slane %v5330_v5, 5  ;;  %v649_v11 = vrot.slane %v5330_v5, 2  ;;  %v5344_v13 = vrot.slane %v5330_v5, 6  ;;  %v717_v18 = vrot.slane %v5330_v5, 7 }
  0xd2   : > { %v588_v15 = vpop.f32.mrf.mxu0  ;;  %v661_v42 = vrot.slane %v5330_v5, 3  ;;  %v4678_v5 = vld [vmem:[%s6210_s3 + $0x388] sm:$0xff] }
  0xd3   : > { %v617_v16 = vpop.f32.mrf.mxu1  ;;  %v589_v19 = vadd.f32 %v5250_v21, %v588_v15  ;;  %1880 = vmatpush.bf16.msra.mxu2 %v4617_v6  ;;  %v652_v20 = vsel %vm643_vm1, %v651_v17, %v649_v11  ;;  %v707_v24 = vsel %vm641_vm0, %v701_v9, %v703_v10  ;;  %v719_v28 = vsel %vm641_vm0, %v715_v14, %v5344_v13  ;;  %v4667_v17 = vld [vmem:[%s6210_s3 + $0x330] sm:$0xff] }
  0xd4   : > { %v750_v25 = vpack.c.bf16 %v649_v11, %v652_v20  ;;  %v5361_v27 = vsel %vm643_vm1, %v707_v24, %v5344_v13  ;;  %v5371_v31 = vsel %vm643_vm1, %v719_v28, %v717_v18  ;;  %v664_v51 = vsel %vm643_vm1, %v663_v47, %v661_v42  ;;  %v4650_v20 = vld [vmem:[%s6210_s3 + $0x2a8] sm:$0xff] }
  0xd5   : > { %v618_v29 = vadd.f32 %v617_v16, %v589_v19  ;;  %v752_v6 = vpack.c.bf16 %v661_v42, %v664_v51  ;;  %v4623_v16 = vld [vmem:[%s6210_s3 + $0x1d0] sm:$0xff]  ;;  %v695_v24 = vrot.slane %v5290_v43, 5  ;;  %v4666_v28 = vld [vmem:[%s6210_s3 + $0x328] sm:$0xff]  ;;  %v4648_v42 = vld [vmem:[%s6210_s3 + $0x298] sm:$0xff] }
  0xd6   : > { %1815 = vmatmul.bf16.vlgmr.msra.gmra.mxu3 %v750_v25  ;;  %1829 = vmatmul.bf16.vlgmr.msrb.gmra.mxu2 %v751_v26  ;;  %v4622_v26 = vld [vmem:[%s6210_s3 + $0x1c8] sm:$0xff] }
  0xd7   : > { %1881 = vmatpush.bf16.msra.mxu2 %v4616_v22  ;;  %1891 = vmatpush.bf16.msra.mxu3 %v4628_v23  ;;  %v631_v35 = vmax.f32 %v618_v29, 0.0 }
  0xd9   : > { %v681_v44 = vrot.slane %v631_v35, 2  ;;  %v666_v45 = vrot.slane %v631_v35, 1  ;;  %v721_v52 = vrot.slane %v631_v35, 4  ;;  %v737_v53 = vrot.slane %v631_v35, 5 }
  0xda   : > { %v590_v36 = vpop.f32.mrf.mxu0 }
  0xdb   : > { %v619_v37 = vpop.f32.mrf.mxu1  ;;  %v591_v39 = vadd.f32 %v5250_v21, %v590_v36  ;;  %1882 = vmatpush.bf16.msra.mxu2 %v4615_v32  ;;  %1892 = vmatpush.bf16.msra.mxu3 %v4627_v34  ;;  %v671_v55 = vsel %vm641_vm0, %v631_v35, %v666_v45  ;;  %v685_v56 = vsel %vm641_vm0, %v666_v45, %v681_v44  ;;  %v693_v34 = vrot.slane %v5274_v33, 4  ;;  %v4660_v44 = vld [vmem:[%s6210_s3 + $0x2f8] sm:$0xff] }
  0xdc   : > { %v697_v35 = vrot.slane %v5290_v43, 6 }
  0xdd   : > { %v620_v46 = vadd.f32 %v619_v37, %v591_v39  ;;  %v4665_v39 = vld [vmem:[%s6210_s3 + $0x320] sm:$0xff] }
  0xdf   : > { %v5389_v48 = vmax.f32 %v620_v46, 0.0  ;;  %1883 = vmatpush.bf16.msra.mxu2 %v4614_v40  ;;  %1893 = vmatpush.bf16.msra.mxu3 %v4626_v41  ;;  %v699_v40 = vsel %vm641_vm0, %v693_v34, %v695_v24 }
  0xe1   : > { %v723_v57 = vrot.slane %v5389_v48, 5  ;;  %v669_v58 = vrot.slane %v5389_v48, 2  ;;  %v683_v59 = vrot.slane %v5389_v48, 3  ;;  %v5407_v60 = vrot.slane %v5389_v48, 6 }
  0xe2   : > { %v593_v61 = vpop.f32.mrf.mxu0  ;;  %v739_v63 = vrot.slane %v5389_v48, 7 }
  0xe3   : > { %v622_v62 = vpop.f32.mrf.mxu1  ;;  %v594_v0 = vadd.f32 %v5250_v21, %v593_v61  ;;  %1884 = vmatpush.bf16.msra.mxu2 %v4613_v49  ;;  %1894 = vmatpush.bf16.msra.mxu3 %v4625_v50  ;;  %v672_v1 = vsel %vm643_vm1, %v671_v55, %v669_v58  ;;  %v686_v4 = vsel %vm643_vm1, %v685_v56, %v683_v59  ;;  %v4676_v56 = vld [vmem:[%s6210_s3 + $0x378] sm:$0xff]  ;;  %v4647_v61 = vld [vmem:[%s6210_s3 + $0x290] sm:$0xff] }
  0xe4   : > { %v753_v7 = vpack.c.bf16 %v669_v58, %v672_v1  ;;  %v727_v9 = vsel %vm641_vm0, %v721_v52, %v723_v57  ;;  %v741_v10 = vsel %vm641_vm0, %v737_v53, %v5407_v60  ;;  %v755_v12 = vpack.c.bf16 %v683_v59, %v686_v4 }
  0xe5   : > { %v623_v11 = vadd.f32 %v622_v62, %v594_v0  ;;  %v5427_v14 = vsel %vm643_vm1, %v727_v9, %v5407_v60  ;;  %v5432_v15 = vsel %vm643_vm1, %v741_v10, %v739_v63  ;;  %v700_v52 = vsel %vm643_vm1, %v699_v40, %v697_v35  ;;  %v4659_v62 = vld [vmem:[%s6210_s3 + $0x2f0] sm:$0xff] }
  0xe6   : > { %1843 = vmatmul.bf16.vlgmr.msrb.gmra.mxu3 %v752_v6  ;;  %1857 = vmatmul.bf16.vlgmr.msrb.gmra.mxu0 %v753_v7  ;;  %v757_v1 = vpack.c.bf16 %v697_v35, %v700_v52  ;;  %v4675_v6 = vld [vmem:[%s6210_s3 + $0x370] sm:$0xff]  ;;  %v4646_v7 = vld [vmem:[%s6210_s3 + $0x288] sm:$0xff]  ;;  %v709_v9 = vrot.slane %v5274_v33, 5  ;;  %v4645_v33 = vld [vmem:[%s6210_s3 + $0x280] sm:$0xff]  ;;  %v761_v34 = vpack.c.bf16 %v5407_v60, %v5427_v14 }
  0xe7   : > { %1933 = vmatpush.bf16.msrb.mxu2 %v4652_v54  ;;  %1895 = vmatpush.bf16.msra.mxu3 %v4624_v2  ;;  %v633_v19 = vmax.f32 %v623_v11, 0.0  ;;  %v4664_v2 = vld [vmem:[%s6210_s3 + $0x318] sm:$0xff]  ;;  %v4663_v10 = vld [vmem:[%s6210_s3 + $0x310] sm:$0xff]  ;;  %v711_v11 = vrot.slane %v5290_v43, 7  ;;  %v4662_v43 = vld [vmem:[%s6210_s3 + $0x308] sm:$0xff] }
  0xe8   : > { %1961 = vmatpush.bf16.msrb.mxu0 %v4668_v3  ;;  %1885 = vmatmul.bf16.vlgmr.msra.gmra.mxu2 %v755_v12  ;;  %v4674_v12 = vld [vmem:[%s6210_s3 + $0x368] sm:$0xff]  ;;  %v4653_v14 = vld [vmem:[%s6210_s3 + $0x2c0] sm:$0xff]  ;;  %v4679_v40 = vld [vmem:[%s6210_s3 + $0x390] sm:$0xff] }
  0xe9   : > { %v687_v29 = vrot.slane %v633_v19, 2  ;;  %v674_v32 = vrot.slane %v633_v19, 1  ;;  %v729_v36 = vrot.slane %v633_v19, 4  ;;  %v743_v41 = vrot.slane %v633_v19, 5  ;;  %v4670_v60 = vld [vmem:[%s6210_s3 + $0x348] sm:$0xff] }
  0xea   : > { %v595_v22 = vpop.f32.mrf.mxu0 }
  0xeb   : > { %1934 = vmatpush.bf16.msrb.mxu2 %v4651_v8  ;;  %v624_v23 = vpop.f32.mrf.mxu1  ;;  %v596_v25 = vadd.f32 %v5250_v21, %v595_v22  ;;  %1896 = vmatpush.bf16.msra.mxu3 %v4623_v16  ;;  %v679_v45 = vsel %vm641_vm0, %v633_v19, %v674_v32  ;;  %v691_v46 = vsel %vm641_vm0, %v674_v32, %v687_v29  ;;  %v4658_v8 = vld [vmem:[%s6210_s3 + $0x2e8] sm:$0xff]  ;;  %v4684_v19 = vld [vmem:[%s6210_s3 + $0x3b8] sm:$0xff]  ;;  %v4673_v22 = vld [vmem:[%s6210_s3 + $0x360] sm:$0xff] }
  0xec   : > { %1962 = vmatpush.bf16.msrb.mxu0 %v4667_v17  ;;  %v713_v16 = vsel %vm641_vm0, %v709_v9, %v697_v35  ;;  %v4657_v17 = vld [vmem:[%s6210_s3 + $0x2e0] sm:$0xff]  ;;  %v758_v29 = vpack.c.bf16 %v5344_v13, %v5361_v27  ;;  %v4682_v32 = vld [vmem:[%s6210_s3 + $0x3a8] sm:$0xff]  ;;  %v4680_v35 = vld [vmem:[%s6210_s3 + $0x398] sm:$0xff] }
  0xed   : > { %v625_v21 = vadd.f32 %v624_v23, %v596_v25  ;;  %v4656_v23 = vld [vmem:[%s6210_s3 + $0x2d8] sm:$0xff]  ;;  %v4661_v25 = vld [vmem:[%s6210_s3 + $0x300] sm:$0xff]  ;;  %v4654_v13 = vld [vmem:[%s6210_s3 + $0x2c8] sm:$0xff] }
  0xee   : > { %v4681_v27 = vld [vmem:[%s6210_s3 + $0x3a0] sm:$0xff] }
  0xef   : > { %1935 = vmatpush.bf16.msrb.mxu2 %v4650_v20  ;;  %v5456_v37 = vmax.f32 %v625_v21, 0.0  ;;  %1897 = vmatpush.bf16.msra.mxu3 %v4622_v26  ;;  %v714_v20 = vsel %vm643_vm1, %v713_v16, %v711_v11  ;;  %v4683_v26 = vld [vmem:[%s6210_s3 + $0x3b0] sm:$0xff]  ;;  %v4705_v9 = vld [vmem:[%s6212_s5 + $0x60] sm:$0xff]  ;;  %v4732_v16 = vld [vmem:[%s6212_s5 + $0x138] sm:$0xff] }
  0xf0   : > { %1963 = vmatpush.bf16.msrb.mxu0 %v4666_v28  ;;  %v759_v24 = vpack.c.bf16 %v711_v11, %v714_v20  ;;  %v4672_v28 = vld [vmem:[%s6210_s3 + $0x358] sm:$0xff]  ;;  %v4671_v21 = vld [vmem:[%s6210_s3 + $0x350] sm:$0xff]  ;;  %v4721_v11 = vld [vmem:[%s6212_s5 + $0xe0] sm:$0xff] }
  0xf1   : > { %v731_v47 = vrot.slane %v5456_v37, 5  ;;  %v677_v49 = vrot.slane %v5456_v37, 2  ;;  %v689_v50 = vrot.slane %v5456_v37, 3  ;;  %v5477_v51 = vrot.slane %v5456_v37, 6 }
  0xf2   : > { %v745_v53 = vrot.slane %v5456_v37, 7  ;;  %v4698_v37 = vld [vmem:[%s6212_s5 + $0x28] sm:$0xff] }
  0xf3   : > { %1936 = vmatpush.bf16.msrb.mxu2 %v4649_v30  ;;  %1898 = vmatpush.bf16.msra.mxu3 %v4621_v38  ;;  %v680_v54 = vsel %vm643_vm1, %v679_v45, %v677_v49  ;;  %v692_v55 = vsel %vm643_vm1, %v691_v46, %v689_v50  ;;  %v735_v57 = vsel %vm641_vm0, %v729_v36, %v731_v47  ;;  %v4655_v30 = vld [vmem:[%s6210_s3 + $0x2d0] sm:$0xff]  ;;  %v4692_v36 = vld [vmem:[%s6210_s3 + $0x3f8] sm:$0xff]  ;;  %v4669_v38 = vld [vmem:[%s6210_s3 + $0x340] sm:$0xff] }
  0xf4   : > { %1964 = vmatpush.bf16.msrb.mxu0 %v4665_v39  ;;  %v754_v58 = vpack.c.bf16 %v677_v49, %v680_v54  ;;  %v756_v59 = vpack.c.bf16 %v689_v50, %v692_v55  ;;  %v5495_v0 = vsel %vm643_vm1, %v735_v57, %v5477_v51  ;;  %v747_v3 = vsel %vm641_vm0, %v743_v41, %v5477_v51  ;;  %v4691_v41 = vld [vmem:[%s6210_s3 + $0x3f0] sm:$0xff]  ;;  %v4688_v45 = vld [vmem:[%s6210_s3 + $0x3d8] sm:$0xff]  ;;  %v4686_v49 = vld [vmem:[%s6210_s3 + $0x3c8] sm:$0xff] }
  0xf5   : > { %v5505_v4 = vsel %vm643_vm1, %v747_v3, %v745_v53  ;;  %v760_v39 = vpack.c.bf16 %v717_v18, %v5371_v31  ;;  %v4690_v18 = vld [vmem:[%s6210_s3 + $0x3e8] sm:$0xff]  ;;  %v4677_v31 = vld [vmem:[%s6210_s3 + $0x380] sm:$0xff]  ;;  %v763_v46 = vpack.c.bf16 %v739_v63, %v5432_v15  ;;  %v4687_v47 = vld [vmem:[%s6210_s3 + $0x3d0] sm:$0xff] }
  0xf6   : > { %1871 = vmatmul.bf16.vlgmr.msrb.gmra.mxu1 %v754_v58  ;;  %1899 = vmatmul.bf16.vlgmr.msra.gmra.mxu3 %v756_v59  ;;  %v4685_v50 = vld [vmem:[%s6210_s3 + $0x3c0] sm:$0xff]  ;;  %v764_v48 = vpack.c.bf16 %v745_v53, %v5505_v4  ;;  %v4700_v63 = vld [vmem:[%s6212_s5 + $0x38] sm:$0xff]  ;;  %v4699_v15 = vld [vmem:[%s6212_s5 + $0x30] sm:$0xff] }
  0xf7   : > { %1937 = vmatpush.bf16.msrb.mxu2 %v4648_v42  ;;  %1947 = vmatpush.bf16.msrb.mxu3 %v4660_v44  ;;  %v762_v42 = vpack.c.bf16 %v5477_v51, %v5495_v0  ;;  %v4689_v44 = vld [vmem:[%s6210_s3 + $0x3e0] sm:$0xff]  ;;  %v4708_v55 = vld [vmem:[%s6212_s5 + $0x78] sm:$0xff]  ;;  %v4723_v0 = vld [vmem:[%s6212_s5 + $0xf0] sm:$0xff] }
  0xf8   : > { %1913 = vmatmul.bf16.vlgmr.msra.gmra.mxu0 %v757_v1  ;;  %1975 = vmatpush.bf16.msrb.mxu1 %v4676_v56  ;;  %v4697_v53 = vld [vmem:[%s6212_s5 + $0x20] sm:$0xff]  ;;  %v4716_v56 = vld [vmem:[%s6212_s5 + $0xb8] sm:$0xff]  ;;  %v4695_v1 = vld [vmem:[%s6212_s5 + $0x10] sm:$0xff] }
  0xf9   : > { %1965 = vmatpush.bf16.msrb.mxu0 %v4664_v2  ;;  %v4724_v57 = vld [vmem:[%s6212_s5 + $0xf8] sm:$0xff]  ;;  %v4706_v2 = vld [vmem:[%s6212_s5 + $0x68] sm:$0xff] }
  0xfa   : > { %v4696_v58 = vld [vmem:[%s6212_s5 + $0x18] sm:$0xff]  ;;  %v4714_v3 = vld [vmem:[%s6212_s5 + $0xa8] sm:$0xff] }
  0xfb   : > { %1938 = vmatpush.bf16.msrb.mxu2 %v4647_v61  ;;  %1948 = vmatpush.bf16.msrb.mxu3 %v4659_v62  ;;  %v4707_v61 = vld [vmem:[%s6212_s5 + $0x70] sm:$0xff]  ;;  %v4722_v4 = vld [vmem:[%s6212_s5 + $0xe8] sm:$0xff] }
  0xfc   : > { %1976 = vmatpush.bf16.msrb.mxu1 %v4675_v6  ;;  %v4715_v62 = vld [vmem:[%s6212_s5 + $0xb0] sm:$0xff]  ;;  %v4694_v6 = vld [vmem:[%s6212_s5 + $0x8] sm:$0xff] }
  0xfd   : > { %1966 = vmatpush.bf16.msrb.mxu0 %v4663_v10  ;;  %v4713_v10 = vld [vmem:[%s6212_s5 + $0xa0] sm:$0xff] }
  0xff   : > { %1939 = vmatpush.bf16.msrb.mxu2 %v4646_v7  ;;  %1949 = vmatpush.bf16.msrb.mxu3 %v4658_v8 }
 0x100   : > { %1977 = vmatpush.bf16.msrb.mxu1 %v4674_v12  ;;  %v4693_v12 = vld [vmem:[%s6212_s5] sm:$0xff] }
 0x101   : > { %1967 = vmatpush.bf16.msrb.mxu0 %v4662_v43  ;;  %v4720_v43 = vld [vmem:[%s6212_s5 + $0xd8] sm:$0xff] }
 0x103   : > { %1940 = vmatpush.bf16.msrb.mxu2 %v4645_v33  ;;  %1950 = vmatpush.bf16.msrb.mxu3 %v4657_v17  ;;  %v4704_v33 = vld [vmem:[%s6212_s5 + $0x58] sm:$0xff] }
 0x104   : > { %1978 = vmatpush.bf16.msrb.mxu1 %v4673_v22  ;;  %v4712_v17 = vld [vmem:[%s6212_s5 + $0x98] sm:$0xff] }
 0x105   : > { %1968 = vmatpush.bf16.msrb.mxu0 %v4661_v25  ;;  %v4719_v25 = vld [vmem:[%s6212_s5 + $0xd0] sm:$0xff] }
 0x106   : > { %1941 = vmatmul.bf16.vlgmr.msrb.gmra.mxu2 %v759_v24  ;;  %1927 = vmatmul.bf16.vlgmr.msra.gmra.mxu1 %v758_v29  ;;  %v4711_v24 = vld [vmem:[%s6212_s5 + $0x90] sm:$0xff] }
 0x107   : > { %1989 = vmatpush.bf16.msra.mxu2 %v4684_v19  ;;  %1951 = vmatpush.bf16.msrb.mxu3 %v4656_v23  ;;  %v4731_v19 = vld [vmem:[%s6212_s5 + $0x130] sm:$0xff] }
 0x108   : > { %1979 = vmatpush.bf16.msrb.mxu1 %v4672_v28  ;;  %1969 = vmatmul.bf16.vlgmr.msrb.gmra.mxu0 %v761_v34  ;;  %v4703_v23 = vld [vmem:[%s6212_s5 + $0x50] sm:$0xff]  ;;  %v4730_v28 = vld [vmem:[%s6212_s5 + $0x128] sm:$0xff] }
 0x109   : > { %2620 = vmatpush.bf16.msra.mxu0 %v4700_v63  ;;  %v4718_v34 = vld [vmem:[%s6212_s5 + $0xc8] sm:$0xff] }
 0x10a   : > { %v4738_v63 = vld [vmem:[%s6212_s5 + $0x168] sm:$0xff] }
 0x10b   : > { %1990 = vmatpush.bf16.msra.mxu2 %v4683_v26  ;;  %1952 = vmatpush.bf16.msrb.mxu3 %v4655_v30  ;;  %v5725_v26 = vld [vmem:[%s6211_s4] ss:$0 sm:$0xff]  ;;  %v4702_v30 = vld [vmem:[%s6212_s5 + $0x48] sm:$0xff] }
 0x10c   : > { %1980 = vmatpush.bf16.msrb.mxu1 %v4671_v21 }
 0x10d   : > { %2621 = vmatpush.bf16.msra.mxu0 %v4699_v15  ;;  %v4746_v15 = vld [vmem:[%s6212_s5 + $0x1a8] sm:$0xff] }
 0x10f   : > { %1991 = vmatpush.bf16.msra.mxu2 %v4682_v32  ;;  %1953 = vmatpush.bf16.msrb.mxu3 %v4654_v13  ;;  %v4710_v32 = vld [vmem:[%s6212_s5 + $0x88] sm:$0xff]  ;;  %v4729_v13 = vld [vmem:[%s6212_s5 + $0x120] sm:$0xff] }
 0x110   : > { %1981 = vmatpush.bf16.msrb.mxu1 %v4670_v60 }
 0x111   : > { %2622 = vmatpush.bf16.msra.mxu0 %v4698_v37  ;;  %v4726_v37 = vld [vmem:[%s6212_s5 + $0x108] sm:$0xff] }
 0x113   : > { %1992 = vmatpush.bf16.msra.mxu2 %v4681_v27  ;;  %1954 = vmatpush.bf16.msrb.mxu3 %v4653_v14 }
 0x114   : > { %1982 = vmatpush.bf16.msrb.mxu1 %v4669_v38  ;;  %v4717_v38 = vld [vmem:[%s6212_s5 + $0xc0] sm:$0xff] }
 0x115   : > { %2623 = vmatpush.bf16.msra.mxu0 %v4697_v53 }
 0x116   : > { %1955 = vmatmul.bf16.vlgmr.msrb.gmra.mxu3 %v760_v39  ;;  %v4740_v39 = vld [vmem:[%s6212_s5 + $0x178] sm:$0xff] }
 0x117   : > { %1993 = vmatpush.bf16.msra.mxu2 %v4680_v35  ;;  %2003 = vmatpush.bf16.msra.mxu3 %v4692_v36  ;;  %v4701_v35 = vld [vmem:[%s6212_s5 + $0x40] sm:$0xff] }
 0x118   : > { %1983 = vmatmul.bf16.vlgmr.msrb.gmra.mxu1 %v762_v42  ;;  %v4709_v36 = vld [vmem:[%s6212_s5 + $0x80] sm:$0xff] }
 0x119   : > { %2633 = vmatpush.bf16.msra.mxu1 %v4708_v55  ;;  %2624 = vmatpush.bf16.msra.mxu0 %v4696_v58  ;;  %v4737_v55 = vld [vmem:[%s6212_s5 + $0x160] sm:$0xff] }
 0x11a   : > { %v4753_v58 = vld [vmem:[%s6212_s5 + $0x1e0] sm:$0xff] }
 0x11b   : > { %1994 = vmatpush.bf16.msra.mxu2 %v4679_v40  ;;  %2004 = vmatpush.bf16.msra.mxu3 %v4691_v41  ;;  %v4748_v40 = vld [vmem:[%s6212_s5 + $0x1b8] sm:$0xff] }
 0x11c   : > { %v4756_v41 = vld [vmem:[%s6212_s5 + $0x1f8] sm:$0xff] }
 0x11d   : > { %2634 = vmatpush.bf16.msra.mxu1 %v4707_v61  ;;  %2625 = vmatpush.bf16.msra.mxu0 %v4695_v1 }
 0x11f   : > { %1995 = vmatpush.bf16.msra.mxu2 %v4678_v5  ;;  %2005 = vmatpush.bf16.msra.mxu3 %v4690_v18  ;;  %v4728_v5 = vld [vmem:[%s6212_s5 + $0x118] sm:$0xff] }
 0x121   : > { %2635 = vmatpush.bf16.msra.mxu1 %v4706_v2  ;;  %2626 = vmatpush.bf16.msra.mxu0 %v4694_v6  ;;  %v4752_v6 = vld [vmem:[%s6212_s5 + $0x1d8] sm:$0xff] }
 0x123   : > { %1996 = vmatpush.bf16.msra.mxu2 %v4677_v31  ;;  %2006 = vmatpush.bf16.msra.mxu3 %v4689_v44  ;;  %v4739_v31 = vld [vmem:[%s6212_s5 + $0x170] sm:$0xff] }
 0x125   : > { %2636 = vmatpush.bf16.msra.mxu1 %v4705_v9  ;;  %2627 = vmatpush.bf16.msra.mxu0 %v4693_v12  ;;  %v4735_v9 = vld [vmem:[%s6212_s5 + $0x150] sm:$0xff] }
 0x126   : > { %1997 = vmatmul.bf16.vlgmr.msra.gmra.mxu2 %v763_v46  ;;  %v4755_v46 = vld [vmem:[%s6212_s5 + $0x1f0] sm:$0xff] }
 0x127   : > { %2007 = vmatpush.bf16.msra.mxu3 %v4688_v45  ;;  %2646 = vmatpush.bf16.msrb.mxu2 %v4716_v56  ;;  %v4747_v45 = vld [vmem:[%s6212_s5 + $0x1b0] sm:$0xff] }
 0x129   : > { %2672 = vmatpush.bf16.msrb.mxu0 %v4732_v16  ;;  %2637 = vmatpush.bf16.msra.mxu1 %v4704_v33 }
 0x12b   : > { %2008 = vmatpush.bf16.msra.mxu3 %v4687_v47  ;;  %2647 = vmatpush.bf16.msrb.mxu2 %v4715_v62  ;;  %v4725_v62 = vld [vmem:[%s6212_s5 + $0x100] sm:$0xff] }
 0x12d   : > { %2673 = vmatpush.bf16.msrb.mxu0 %v4731_v19  ;;  %2638 = vmatpush.bf16.msra.mxu1 %v4703_v23  ;;  %v4742_v19 = vld [vmem:[%s6212_s5 + $0x188] sm:$0xff] }
 0x12f   : > { %2009 = vmatpush.bf16.msra.mxu3 %v4686_v49  ;;  %2648 = vmatpush.bf16.msrb.mxu2 %v4714_v3  ;;  %v4727_v49 = vld [vmem:[%s6212_s5 + $0x110] sm:$0xff]  ;;  %v4736_v3 = vld [vmem:[%s6212_s5 + $0x158] sm:$0xff] }
 0x131   : > { %2674 = vmatpush.bf16.msrb.mxu0 %v4730_v28  ;;  %2639 = vmatpush.bf16.msra.mxu1 %v4702_v30  ;;  %v4741_v28 = vld [vmem:[%s6212_s5 + $0x180] sm:$0xff] }
 0x132   : > { %v4749_v30 = vld [vmem:[%s6212_s5 + $0x1c0] sm:$0xff] }
 0x133   : > { %2010 = vmatpush.bf16.msra.mxu3 %v4685_v50  ;;  %2649 = vmatpush.bf16.msrb.mxu2 %v4713_v10  ;;  %v4743_v10 = vld [vmem:[%s6212_s5 + $0x190] sm:$0xff] }
 0x135   : > { %2675 = vmatpush.bf16.msrb.mxu0 %v4729_v13  ;;  %2640 = vmatpush.bf16.msra.mxu1 %v4701_v35 }
 0x136   : > { %2011 = vmatmul.bf16.vlgmr.msra.gmra.mxu3 %v764_v48 }
 0x137   : > { %2659 = vmatpush.bf16.msrb.mxu3 %v4724_v57  ;;  %2650 = vmatpush.bf16.msrb.mxu2 %v4712_v17  ;;  %v4745_v57 = vld [vmem:[%s6212_s5 + $0x1a0] sm:$0xff] }
 0x139   : > { %2685 = vmatpush.bf16.msrb.mxu1 %v4740_v39  ;;  %2676 = vmatpush.bf16.msrb.mxu0 %v4728_v5 }
 0x13b   : > { %2660 = vmatpush.bf16.msrb.mxu3 %v4723_v0  ;;  %2651 = vmatpush.bf16.msrb.mxu2 %v4711_v24 }
 0x13d   : > { %2686 = vmatpush.bf16.msrb.mxu1 %v4739_v31  ;;  %2677 = vmatpush.bf16.msrb.mxu0 %v4727_v49 }
 0x13f   : > { %2661 = vmatpush.bf16.msrb.mxu3 %v4722_v4  ;;  %2652 = vmatpush.bf16.msrb.mxu2 %v4710_v32  ;;  %v4744_v4 = vld [vmem:[%s6212_s5 + $0x198] sm:$0xff] }
 0x141   : > { %2687 = vmatpush.bf16.msrb.mxu1 %v4738_v63  ;;  %2678 = vmatpush.bf16.msrb.mxu0 %v4726_v37 }
 0x143   : > { %2662 = vmatpush.bf16.msrb.mxu3 %v4721_v11  ;;  %2653 = vmatpush.bf16.msrb.mxu2 %v4709_v36  ;;  %v4751_v11 = vld [vmem:[%s6212_s5 + $0x1d0] sm:$0xff] }
 0x145   : > { %2688 = vmatpush.bf16.msrb.mxu1 %v4737_v55  ;;  %2679 = vmatpush.bf16.msrb.mxu0 %v4725_v62 }
 0x147   : > { %2663 = vmatpush.bf16.msrb.mxu3 %v4720_v43  ;;  %2698 = vmatpush.bf16.msra.mxu2 %v4748_v40  ;;  %v4734_v43 = vld [vmem:[%s6212_s5 + $0x148] sm:$0xff] }
 0x149   : > { %v5634_v51 = vpop.f32.mrf.mxu2  ;;  %2689 = vmatpush.bf16.msrb.mxu1 %v4736_v3 }
 0x14a   : > { %v1803_v27 = vadd.f32 %v5725_v26, %v5634_v51  ;;  %v4754_v51 = vld [vmem:[%s6212_s5 + $0x1e8] sm:$0xff] }
 0x14b   : > { %2664 = vmatpush.bf16.msrb.mxu3 %v4719_v25  ;;  %2699 = vmatpush.bf16.msra.mxu2 %v4747_v45 }
 0x14d   : > { %2690 = vmatpush.bf16.msrb.mxu1 %v4735_v9 }
 0x14f   : > { %2665 = vmatpush.bf16.msrb.mxu3 %v4718_v34  ;;  %2700 = vmatpush.bf16.msra.mxu2 %v4746_v15  ;;  %v4762_v15 = vld [vmem:[%s6212_s5 + $0x228] sm:$0xff] }
 0x151   : > { %v5644_v54 = vpop.f32.mrf.mxu2  ;;  %2691 = vmatpush.bf16.msrb.mxu1 %v4734_v43  ;;  %v4396_v43 = vld [vmem:[%s6214_s7 + $0xe0] sm:$0xf] }
 0x152   : > { %v1805_v17 = vadd.f32 %v5725_v26, %v5644_v54  ;;  %v4733_v26 = vld [vmem:[%s6212_s5 + $0x140] sm:$0xff] }
 0x153   : > { %2666 = vmatpush.bf16.msrb.mxu3 %v4717_v38  ;;  %2701 = vmatpush.bf16.msra.mxu2 %v4745_v57 }
 0x155   : > { %2692 = vmatpush.bf16.msrb.mxu1 %v4733_v26 }
 0x157   : > { %2711 = vmatpush.bf16.msra.mxu3 %v4756_v41  ;;  %2702 = vmatpush.bf16.msra.mxu2 %v4744_v4 }
 0x159   : > { %v5636_v52 = vpop.f32.mrf.mxu3  ;;  %v1830_v7 = vpop.f32.mrf.mxu2 }
 0x15a   : > { %v1817_v60 = vadd.f32 %v5636_v52, %v1803_v27 }
 0x15b   : > { %2712 = vmatpush.bf16.msra.mxu3 %v4755_v46  ;;  %2703 = vmatpush.bf16.msra.mxu2 %v4743_v10 }
 0x15c   : > { %v1831_v18 = vadd.f32 %v1830_v7, %v1817_v60 }
 0x15f   : > { %2713 = vmatpush.bf16.msra.mxu3 %v4754_v51  ;;  %2704 = vmatpush.bf16.msra.mxu2 %v4742_v19  ;;  %v4795_v19 = vld [vmem:[%s6214_s7 + $0xec] sm:$0xf0] }
 0x161   : > { %v5658_v59 = vpop.f32.mrf.mxu3  ;;  %v5711_v20 = vpop.f32.mrf.mxu2 }
 0x162   : > { %v1819_v23 = vadd.f32 %v5658_v59, %v1805_v17 }
 0x163   : > { %v1858_v22 = vpop.f32.mrf.mxu0  ;;  %2714 = vmatpush.bf16.msra.mxu3 %v4753_v58  ;;  %2705 = vmatpush.bf16.msra.mxu2 %v4741_v28  ;;  %v4760_v58 = vld [vmem:[%s6212_s5 + $0x218] sm:$0xff] }
 0x164   : > { %v1833_v59 = vadd.f32 %v5711_v20, %v1819_v23  ;;  %v4397_v23 = vor.u32 %v4795_v19, %v4396_v43  ;;  %v4318_v43 = vld [vmem:[%s6214_s7 + $0x50] sm:$0xf0]  ;;  %v4324_v19 = vld [vmem:[%s6214_s7 + $0x48] sm:$0xf] }
 0x167   : > { %2715 = vmatpush.bf16.msra.mxu3 %v4752_v6 }
 0x169   : > { %v1844_v8 = vpop.f32.mrf.mxu3 }
 0x16a   : > { %v1845_v47 = vadd.f32 %v1844_v8, %v1831_v18 }
 0x16b   : > { %v1886_v14 = vpop.f32.mrf.mxu2  ;;  %v5765_v42 = vpop.f32.mrf.mxu0  ;;  %2716 = vmatpush.bf16.msra.mxu3 %v4751_v11  ;;  %v4758_v11 = vld [vmem:[%s6212_s5 + $0x208] sm:$0xff] }
 0x16c   : > { %v1859_v48 = vadd.f32 %v1858_v22, %v1845_v47  ;;  %v4750_v22 = vld [vmem:[%s6212_s5 + $0x1c8] sm:$0xff] }
 0x16f   : > { %2717 = vmatpush.bf16.msra.mxu3 %v4750_v22  ;;  %v4793_v22 = vld [vmem:[%s6214_s7 + $0xe4] sm:$0xf] }
 0x171   : > { %v5730_v29 = vpop.f32.mrf.mxu3 }
 0x172   : > { %v1847_v34 = vadd.f32 %v5730_v29, %v1833_v59  ;;  %v4764_v29 = vld [vmem:[%s6212_s5 + $0x238] sm:$0xff] }
 0x173   : > { %v1872_v21 = vpop.f32.mrf.mxu1  ;;  %v5793_v52 = vpop.f32.mrf.mxu2  ;;  %2718 = vmatpush.bf16.msra.mxu3 %v4749_v30  ;;  %v4794_v30 = vld [vmem:[%s6214_s7 + $0xec] sm:$0xf] }
 0x174   : > { %v1873_v53 = vadd.f32 %v1872_v21, %v1859_v48  ;;  %v1861_v60 = vadd.f32 %v5765_v42, %v1847_v34  ;;  %v4380_v34 = vld [vmem:[%s6214_s7 + $0xc0] sm:$0xf] }
 0x175   : > { %v1914_v56 = vpop.f32.mrf.mxu0 }
 0x176   : > { %v1887_v0 = vadd.f32 %v1886_v14, %v1873_v53 }
 0x179   : > { %v1900_v44 = vpop.f32.mrf.mxu3 }
 0x17a   : > { %v1901_v2 = vadd.f32 %v1900_v44, %v1887_v0 }
 0x17b   : > { %v5782_v50 = vpop.f32.mrf.mxu1 }
 0x17c   : > { %v1915_v8 = vadd.f32 %v1914_v56, %v1901_v2  ;;  %v1875_v38 = vadd.f32 %v5782_v50, %v1861_v60  ;;  %v4763_v50 = vld [vmem:[%s6212_s5 + $0x230] sm:$0xff] }
 0x17d   : > { %v1916_v12 = vpop.f32.mrf.mxu0  ;;  %v4382_v60 = vld [vmem:[%s6214_s7 + $0xd0] sm:$0xf0] }
 0x17e   : > { %v1889_v20 = vadd.f32 %v5793_v52, %v1875_v38  ;;  %v4761_v52 = vld [vmem:[%s6212_s5 + $0x220] sm:$0xff] }
 0x181   : > { %v1902_v61 = vpop.f32.mrf.mxu3 }
 0x182   : > { %v1903_v18 = vadd.f32 %v1902_v61, %v1889_v20  ;;  %v4364_v20 = vld [vmem:[%s6214_s7 + $0xa0] sm:$0xf] }
 0x183   : > { %v1928_v1 = vpop.f32.mrf.mxu1 }
 0x184   : > { %v1929_v33 = vadd.f32 %v1928_v1, %v1915_v8  ;;  %v1917_v48 = vadd.f32 %v1916_v12, %v1903_v18  ;;  %v4785_v18 = vld [vmem:[%s6214_s7 + $0xa4] sm:$0xf] }
 0x185   : > { %v1970_v21 = vpop.f32.mrf.mxu0 }
 0x189   : > { %v1942_v7 = vpop.f32.mrf.mxu2 }
 0x18a   : > { %v1943_v25 = vadd.f32 %v1942_v7, %v1929_v33  ;;  %v4759_v7 = vld [vmem:[%s6212_s5 + $0x210] sm:$0xff] }
 0x18b   : > { %v1930_v24 = vpop.f32.mrf.mxu1 }
 0x18c   : > { %v1931_v63 = vadd.f32 %v1930_v24, %v1917_v48  ;;  %v4398_v24 = vld [vmem:[%s6214_s7 + $0xf0] sm:$0xf0]  ;;  %v4348_v48 = vld [vmem:[%s6214_s7 + $0x80] sm:$0xf] }
 0x18d   : > { %v1972_v57 = vpop.f32.mrf.mxu0  ;;  %v4401_v26 = vor.u32 %v4793_v22, %v4398_v24  ;;  %v4776_v22 = vld [vmem:[%s6214_s7 + $0x54] sm:$0xf0] }
 0x18e   : > { %v4325_v24 = vor.u32 %v4776_v22, %v4324_v19  ;;  %v4824_v19 = vld [vmem:[%s6216_s9 + $0xd8] sm:$0xff] }
 0x18f   : > { %v4808_v22 = vld [vmem:[%s6216_s9 + $0x58] sm:$0xff] }
 0x191   : > { %v1944_v54 = vpop.f32.mrf.mxu2 }
 0x192   : > { %v1945_v51 = vadd.f32 %v1944_v54, %v1931_v63  ;;  %v4796_v54 = vld [vmem:[%s6214_s7 + $0xf4] sm:$0xf0]  ;;  %v4783_v63 = vld [vmem:[%s6214_s7 + $0x8c] sm:$0xf0] }
 0x195   : > { %v1984_v14 = vpop.f32.mrf.mxu1 }
 0x199   : > { %v1956_v16 = vpop.f32.mrf.mxu3 }
 0x19a   : > { %v1957_v32 = vadd.f32 %v1956_v16, %v1943_v25  ;;  %v4757_v16 = vld [vmem:[%s6212_s5 + $0x200] sm:$0xff]  ;;  %v4404_v25 = vld [vmem:[%s6214_s7 + $0xe8] sm:$0xf] }
 0x19b   : > { %v4405_v28 = vor.u32 %v4796_v54, %v4404_v25  ;;  %v4774_v25 = vld [vmem:[%s6214_s7 + $0x4c] sm:$0xf]  ;;  %v4326_v54 = vld [vmem:[%s6214_s7 + $0x58] sm:$0xf0] }
 0x19c   : > { %v1971_v27 = vadd.f32 %v1970_v21, %v1957_v32  ;;  %v4406_v32 = vld [vmem:[%s6214_s7 + $0xf8] sm:$0xf0]  ;;  %v4791_v21 = vld [vmem:[%s6214_s7 + $0xcc] sm:$0xf0] }
 0x19d   : > { %v1986_v3 = vpop.f32.mrf.mxu1  ;;  %v4409_v59 = vor.u32 %v4794_v30, %v4406_v32  ;;  %v4771_v30 = vld [vmem:[%s6214_s7 + $0x2c] sm:$0xf0]  ;;  %v4769_v32 = vld [vmem:[%s6214_s7 + $0x24] sm:$0xf] }
 0x19e   : > { %v1985_v36 = vadd.f32 %v1984_v14, %v1971_v27  ;;  %v4381_v27 = vor.u32 %v4791_v21, %v4380_v34  ;;  %v4388_v14 = vld [vmem:[%s6214_s7 + $0xc8] sm:$0xf]  ;;  %v4302_v34 = vld [vmem:[%s6214_s7 + $0x30] sm:$0xf0] }
 0x19f   : > { %v4308_v21 = vld [vmem:[%s6214_s7 + $0x28] sm:$0xf] }
 0x1a1   : > { %v1958_v13 = vpop.f32.mrf.mxu3 }
 0x1a2   : > { %v1959_v37 = vadd.f32 %v1958_v13, %v1945_v51  ;;  %v4789_v13 = vld [vmem:[%s6214_s7 + $0xc4] sm:$0xf]  ;;  %v4349_v51 = vor.u32 %v4783_v63, %v4348_v48  ;;  %v4804_v63 = vld [vmem:[%s6216_s9 + $0x38] sm:$0xff] }
 0x1a4   : > { %v1973_v62 = vadd.f32 %v1972_v57, %v1959_v37  ;;  %v4356_v37 = vld [vmem:[%s6214_s7 + $0x88] sm:$0xf]  ;;  %v4782_v57 = vld [vmem:[%s6214_s7 + $0x8c] sm:$0xf] }
 0x1a6   : > { %v1987_v8 = vadd.f32 %v1986_v3, %v1973_v62  ;;  %v4332_v62 = vld [vmem:[%s6214_s7 + $0x60] sm:$0xf]  ;;  %v4334_v3 = vld [vmem:[%s6214_s7 + $0x70] sm:$0xf0] }
 0x1a9   : > { %v1998_v35 = vpop.f32.mrf.mxu2 }
 0x1aa   : > { %v1999_v39 = vadd.f32 %v1998_v35, %v1985_v36  ;;  %v4792_v35 = vld [vmem:[%s6214_s7 + $0xd4] sm:$0xf0]  ;;  %v4385_v36 = vor.u32 %v4789_v13, %v4382_v60  ;;  %v4305_v60 = vor.u32 %v4769_v32, %v4302_v34  ;;  %v4823_v32 = vld [vmem:[%s6216_s9 + $0xd0] sm:$0xff] }
 0x1ab   : > { %v4389_v38 = vor.u32 %v4792_v35, %v4388_v14  ;;  %v4772_v13 = vld [vmem:[%s6214_s7 + $0x34] sm:$0xf0]  ;;  %v4770_v35 = vld [vmem:[%s6214_s7 + $0x2c] sm:$0xf] }
 0x1ac   : > { %v4309_v14 = vor.u32 %v4772_v13, %v4308_v21 }
 0x1b1   : > { %v2000_v4 = vpop.f32.mrf.mxu2 }
 0x1b2   : > { %v2001_v10 = vadd.f32 %v2000_v4, %v1987_v8  ;;  %v4340_v4 = vld [vmem:[%s6214_s7 + $0x68] sm:$0xf] }
 0x1b9   : > { %v2012_v40 = vpop.f32.mrf.mxu3 }
 0x1ba   : > { %v2013_v41 = vadd.f32 %v2012_v40, %v1999_v39  ;;  %v4790_v39 = vld [vmem:[%s6214_s7 + $0xcc] sm:$0xf]  ;;  %v4390_v40 = vld [vmem:[%s6214_s7 + $0xd8] sm:$0xf0] }
 0x1bc   : > { %v2017_v5 = vmax.f32 %v2013_v41, 0.0  ;;  %v4393_v41 = vor.u32 %v4790_v39, %v4390_v40  ;;  %v4284_v40 = vld [vmem:[%s6214_s7] sm:$0xf] }
 0x1be   : > { %v2034_v31 = vpack.c.bf16 %v2017_v5, %v2017_v5  ;;  %v2020_v44 = vrot.slane %v2017_v5, 1  ;;  %v2022_v45 = vrot.slane %v2017_v5, 2  ;;  %v2024_v42 = vrot.slane %v2017_v5, 3 }
 0x1bf   : > { %v2026_v53 = vrot.slane %v2017_v5, 4  ;;  %v2028_v55 = vrot.slane %v2017_v5, 5  ;;  %v2030_v56 = vrot.slane %v2017_v5, 6  ;;  %v2032_v61 = vrot.slane %v2017_v5, 7  ;;  %v4787_v5 = vld [vmem:[%s6214_s7 + $0xac] sm:$0xf0] }
 0x1c0   : > { %2628 = vmatmul.bf16.vlgmr.msra.gmra.mxu0 %v2034_v31  ;;  %v2035_v46 = vpack.c.bf16 %v2020_v44, %v2020_v44  ;;  %v2036_v47 = vpack.c.bf16 %v2022_v45, %v2022_v45  ;;  %v2037_v49 = vpack.c.bf16 %v2024_v42, %v2024_v42  ;;  %v4366_v31 = vld [vmem:[%s6214_s7 + $0xb0] sm:$0xf0]  ;;  %v4372_v44 = vld [vmem:[%s6214_s7 + $0xa8] sm:$0xf]  ;;  %v4788_v45 = vld [vmem:[%s6214_s7 + $0xb4] sm:$0xf0] }
 0x1c1   : > { %2724 = vmatpush.bf16.msra.mxu0 %v4764_v29  ;;  %v2038_v0 = vpack.c.bf16 %v2026_v53, %v2026_v53  ;;  %v2039_v1 = vpack.c.bf16 %v2028_v55, %v2028_v55  ;;  %v2040_v2 = vpack.c.bf16 %v2030_v56, %v2030_v56  ;;  %v2041_v6 = vpack.c.bf16 %v2032_v61, %v2032_v61  ;;  %v2014_v9 = vpop.f32.mrf.mxu3  ;;  %v4784_v53 = vld [vmem:[%s6214_s7 + $0x94] sm:$0xf0] }
 0x1c2   : > { %2641 = vmatmul.bf16.vlgmr.msra.gmra.mxu1 %v2035_v46  ;;  %2654 = vmatmul.bf16.vlgmr.msrb.gmra.mxu2 %v2036_v47  ;;  %v2015_v12 = vadd.f32 %v2014_v9, %v2001_v10  ;;  %v4365_v29 = vor.u32 %v4787_v5, %v4364_v20  ;;  %v4369_v42 = vor.u32 %v4785_v18, %v4366_v31  ;;  %v4786_v47 = vld [vmem:[%s6214_s7 + $0xac] sm:$0xf]  ;;  %v4342_v10 = vld [vmem:[%s6214_s7 + $0x78] sm:$0xf0]  ;;  %v4765_v20 = vld [vmem:[%s6214_s7 + $0x4] sm:$0xf] }
 0x1c3   : > { %2667 = vmatmul.bf16.vlgmr.msrb.gmra.mxu3 %v2037_v49  ;;  %2941 = vmatpush.bf16.msra.mxu1 %v4397_v23  ;;  %v4373_v46 = vor.u32 %v4788_v45, %v4372_v44  ;;  %v4374_v49 = vld [vmem:[%s6214_s7 + $0xb8] sm:$0xf0]  ;;  %v4357_v56 = vor.u32 %v4784_v53, %v4356_v37  ;;  %v4778_v9 = vld [vmem:[%s6214_s7 + $0x6c] sm:$0xf]  ;;  %v4286_v18 = vld [vmem:[%s6214_s7 + $0x10] sm:$0xf0] }
 0x1c4   : > { %v2018_v33 = vmax.f32 %v2015_v12, 0.0  ;;  %2954 = vmatpush.bf16.msrb.mxu2 %v4401_v26  ;;  %2967 = vmatpush.bf16.msrb.mxu3 %v4405_v28  ;;  %v4316_v12 = vld [vmem:[%s6214_s7 + $0x40] sm:$0xf]  ;;  %v4329_v26 = vor.u32 %v4774_v25, %v4326_v54  ;;  %v4768_v31 = vld [vmem:[%s6214_s7 + $0x14] sm:$0xf0]  ;;  %v4289_v44 = vor.u32 %v4765_v20, %v4286_v18  ;;  %v4806_v18 = vld [vmem:[%s6216_s9 + $0x48] sm:$0xff] }
 0x1c5   : > { %2725 = vmatpush.bf16.msra.mxu0 %v4763_v50  ;;  %v4377_v50 = vor.u32 %v4786_v47, %v4374_v49  ;;  %v4300_v28 = vld [vmem:[%s6214_s7 + $0x20] sm:$0xf]  ;;  %v4812_v37 = vld [vmem:[%s6216_s9 + $0x78] sm:$0xff] }
 0x1c6   : > { %v2042_v17 = vpack.c.bf16 %v2018_v33, %v2018_v33  ;;  %v4773_v33 = vld [vmem:[%s6214_s7 + $0x44] sm:$0xf]  ;;  %v2187_v49 = vld [vmem:[%s6213_s6] sm:$0x1]  ;;  %v4820_v53 = vld [vmem:[%s6216_s9 + $0xb8] sm:$0xff] }
 0x1c7   : > { %2942 = vmatpush.bf16.msra.mxu1 %v4381_v27  ;;  %v4321_v23 = vor.u32 %v4773_v33, %v4318_v43  ;;  %v4817_v33 = vld [vmem:[%s6216_s9 + $0xa0] sm:$0xff]  ;;  %v4800_v43 = vld [vmem:[%s6216_s9 + $0x18] sm:$0xff] }
 0x1c8   : > { %2955 = vmatpush.bf16.msrb.mxu2 %v4385_v36  ;;  %2968 = vmatpush.bf16.msrb.mxu3 %v4389_v38  ;;  %v4310_v36 = vld [vmem:[%s6214_s7 + $0x38] sm:$0xf0]  ;;  %v4797_v20 = vld [vmem:[%s6216_s9] sm:$0xff] }
 0x1c9   : > { %2726 = vmatpush.bf16.msra.mxu0 %v4762_v15  ;;  %v4781_v15 = vld [vmem:[%s6214_s7 + $0x84] sm:$0xf]  ;;  %v4313_v38 = vor.u32 %v4770_v35, %v4310_v36 }
 0x1cb   : > { %2943 = vmatpush.bf16.msra.mxu1 %v4365_v29  ;;  %v4292_v29 = vld [vmem:[%s6214_s7 + $0x8] sm:$0xf] }
 0x1cc   : > { %2956 = vmatpush.bf16.msrb.mxu2 %v4369_v42  ;;  %2969 = vmatpush.bf16.msrb.mxu3 %v4373_v46  ;;  %v4293_v45 = vor.u32 %v4768_v31, %v4292_v29  ;;  %v4766_v42 = vld [vmem:[%s6214_s7 + $0xc] sm:$0xf]  ;;  %v4294_v46 = vld [vmem:[%s6214_s7 + $0x18] sm:$0xf0]  ;;  %v4805_v31 = vld [vmem:[%s6216_s9 + $0x40] sm:$0xff] }
 0x1cd   : > { %2727 = vmatpush.bf16.msra.mxu0 %v4761_v52  ;;  %v4350_v52 = vld [vmem:[%s6214_s7 + $0x90] sm:$0xf0]  ;;  %v4297_v47 = vor.u32 %v4766_v42, %v4294_v46  ;;  %v4814_v29 = vld [vmem:[%s6216_s9 + $0x88] sm:$0xff] }
 0x1ce   : > { %v4353_v55 = vor.u32 %v4781_v15, %v4350_v52  ;;  %v4828_v15 = vld [vmem:[%s6216_s9 + $0xf8] sm:$0xff] }
 0x1cf   : > { %2944 = vmatpush.bf16.msra.mxu1 %v4349_v51 }
 0x1d0   : > { %2680 = vmatmul.bf16.vlgmr.msrb.gmra.mxu0 %v2038_v0  ;;  %2957 = vmatpush.bf16.msrb.mxu2 %v4353_v55  ;;  %v4779_v0 = vld [vmem:[%s6214_s7 + $0x6c] sm:$0xf0] }
 0x1d1   : > { %2728 = vmatpush.bf16.msra.mxu0 %v4760_v58  ;;  %v4358_v58 = vld [vmem:[%s6214_s7 + $0x98] sm:$0xf0]  ;;  %2970 = vmatpush.bf16.msrb.mxu3 %v4357_v56  ;;  %v4803_v56 = vld [vmem:[%s6216_s9 + $0x30] sm:$0xff] }
 0x1d2   : > { %2693 = vmatmul.bf16.vlgmr.msrb.gmra.mxu1 %v2039_v1  ;;  %2706 = vmatmul.bf16.vlgmr.msra.gmra.mxu2 %v2040_v2  ;;  %v4361_v61 = vor.u32 %v4782_v57, %v4358_v58  ;;  %v4777_v1 = vld [vmem:[%s6214_s7 + $0x64] sm:$0xf]  ;;  %v4333_v2 = vor.u32 %v4779_v0, %v4332_v62  ;;  %v4827_v57 = vld [vmem:[%s6216_s9 + $0xf0] sm:$0xff]  ;;  %v4802_v0 = vld [vmem:[%s6216_s9 + $0x28] sm:$0xff] }
 0x1d3   : > { %2719 = vmatmul.bf16.vlgmr.msra.gmra.mxu3 %v2041_v6  ;;  %v4780_v6 = vld [vmem:[%s6214_s7 + $0x74] sm:$0xf0]  ;;  %v4811_v58 = vld [vmem:[%s6216_s9 + $0x70] sm:$0xff] }
 0x1d4   : > { %v4341_v8 = vor.u32 %v4780_v6, %v4340_v4  ;;  %2945 = vmatpush.bf16.msra.mxu1 %v4333_v2  ;;  %v4818_v4 = vld [vmem:[%s6216_s9 + $0xa8] sm:$0xff] }
 0x1d5   : > { %2729 = vmatpush.bf16.msra.mxu0 %v4759_v7  ;;  %v4337_v7 = vor.u32 %v4777_v1, %v4334_v3  ;;  %v4826_v1 = vld [vmem:[%s6216_s9 + $0xe8] sm:$0xff] }
 0x1d6   : > { %2971 = vmatpush.bf16.msrb.mxu3 %v4341_v8  ;;  %v4810_v3 = vld [vmem:[%s6216_s9 + $0x68] sm:$0xff] }
 0x1d7   : > { %2958 = vmatpush.bf16.msrb.mxu2 %v4337_v7 }
 0x1d9   : > { %2730 = vmatpush.bf16.msra.mxu0 %v4758_v11  ;;  %v4345_v11 = vor.u32 %v4778_v9, %v4342_v10  ;;  %v4801_v10 = vld [vmem:[%s6216_s9 + $0x20] sm:$0xff] }
 0x1da   : > { %2972 = vmatpush.bf16.msrb.mxu3 %v4325_v24 }
 0x1db   : > { %2959 = vmatpush.bf16.msrb.mxu2 %v4321_v23  ;;  %v4816_v23 = vld [vmem:[%s6216_s9 + $0x98] sm:$0xff] }
 0x1dd   : > { %2731 = vmatpush.bf16.msra.mxu0 %v4757_v16  ;;  %v4775_v16 = vld [vmem:[%s6214_s7 + $0x4c] sm:$0xf0] }
 0x1de   : > { %2973 = vmatpush.bf16.msrb.mxu3 %v4309_v14 }
 0x1df   : > { %2960 = vmatpush.bf16.msrb.mxu2 %v4305_v60 }
 0x1e0   : > { %2732 = vmatmul.bf16.vlgmr.msra.gmra.mxu0 %v2042_v17  ;;  %v4317_v17 = vor.u32 %v4775_v16, %v4316_v12  ;;  %v4809_v16 = vld [vmem:[%s6216_s9 + $0x60] sm:$0xff] }
 0x1e1   : > { %2980 = vmatpush.bf16.msrb.mxu0 %v4409_v59  ;;  %v4301_v59 = vor.u32 %v4771_v30, %v4300_v28  ;;  %v4799_v30 = vld [vmem:[%s6216_s9 + $0x10] sm:$0xff] }
 0x1e2   : > { %2946 = vmatpush.bf16.msra.mxu1 %v4317_v17  ;;  %2974 = vmatpush.bf16.msrb.mxu3 %v4293_v45  ;;  %v2771_v45 = vld [vmem:[%s6215_s8] sm:$0xf] }
 0x1e3   : > { %2961 = vmatpush.bf16.msrb.mxu2 %v4289_v44  ;;  %v4813_v44 = vld [vmem:[%s6216_s9 + $0x80] sm:$0xff]  ;;  %v2933_v42 = vperm.slane %v2771_v45, 0  ;;  %v2936_v46 = vperm.slane %v2771_v45, 3 }
 0x1e5   : > { %2981 = vmatpush.bf16.msrb.mxu0 %v4393_v41  ;;  %v4767_v41 = vld [vmem:[%s6214_s7 + $0xc] sm:$0xf0] }
 0x1e6   : > { %2947 = vmatpush.bf16.msra.mxu1 %v4301_v59  ;;  %v4285_v5 = vor.u32 %v4767_v41, %v4284_v40  ;;  %3284 = vmatpush.bf16.msra.mxu3 %v4820_v53  ;;  %v4807_v40 = vld [vmem:[%s6216_s9 + $0x50] sm:$0xff] }
 0x1e7   : > { %3271 = vmatpush.bf16.msra.mxu2 %v4812_v37  ;;  %v4815_v41 = vld [vmem:[%s6216_s9 + $0x90] sm:$0xff] }
 0x1e9   : > { %2982 = vmatpush.bf16.msrb.mxu0 %v4377_v50 }
 0x1ea   : > { %2948 = vmatpush.bf16.msra.mxu1 %v4285_v5  ;;  %v4821_v5 = vld [vmem:[%s6216_s9 + $0xc0] sm:$0xff] }
 0x1eb   : > { %3272 = vmatpush.bf16.msra.mxu2 %v4811_v58 }
 0x1ed   : > { %2983 = vmatpush.bf16.msrb.mxu0 %v4361_v61  ;;  %v4819_v61 = vld [vmem:[%s6216_s9 + $0xb0] sm:$0xff] }
 0x1ee   : > { %3258 = vmatpush.bf16.msrb.mxu1 %v4804_v63  ;;  %3285 = vmatpush.bf16.msra.mxu3 %v4819_v61 }
 0x1ef   : > { %3273 = vmatpush.bf16.msra.mxu2 %v4810_v3 }
 0x1f1   : > { %2984 = vmatpush.bf16.msrb.mxu0 %v4345_v11  ;;  %v4825_v11 = vld [vmem:[%s6216_s9 + $0xe0] sm:$0xff] }
 0x1f2   : > { %3259 = vmatpush.bf16.msrb.mxu1 %v4803_v56  ;;  %3286 = vmatpush.bf16.msra.mxu3 %v4818_v4 }
 0x1f3   : > { %3274 = vmatpush.bf16.msra.mxu2 %v4809_v16 }
 0x1f5   : > { %2985 = vmatpush.bf16.msrb.mxu0 %v4329_v26 }
 0x1f6   : > { %3260 = vmatpush.bf16.msrb.mxu1 %v4802_v0  ;;  %3287 = vmatpush.bf16.msra.mxu3 %v4817_v33 }
 0x1f7   : > { %3275 = vmatpush.bf16.msra.mxu2 %v4808_v22 }
 0x1f9   : > { %2986 = vmatpush.bf16.msrb.mxu0 %v4313_v38  ;;  %v4798_v38 = vld [vmem:[%s6216_s9 + $0x8] sm:$0xff] }
 0x1fa   : > { %3261 = vmatpush.bf16.msrb.mxu1 %v4801_v10  ;;  %3288 = vmatpush.bf16.msra.mxu3 %v4816_v23 }
 0x1fb   : > { %3276 = vmatpush.bf16.msra.mxu2 %v4807_v40 }
 0x1fd   : > { %2987 = vmatpush.bf16.msrb.mxu0 %v4297_v47 }
 0x1fe   : > { %3262 = vmatpush.bf16.msrb.mxu1 %v4800_v43  ;;  %3289 = vmatpush.bf16.msra.mxu3 %v4815_v41 }
 0x1ff   : > { %3277 = vmatpush.bf16.msra.mxu2 %v4806_v18 }
 0x201   : > { %3297 = vmatpush.bf16.msra.mxu0 %v4828_v15  ;;  %v2934_v15 = vperm.slane %v2771_v45, 1 }
 0x202   : > { %3263 = vmatpush.bf16.msrb.mxu1 %v4799_v30  ;;  %3290 = vmatpush.bf16.msra.mxu3 %v4814_v29 }
 0x203   : > { %3278 = vmatpush.bf16.msra.mxu2 %v4805_v31 }
 0x205   : > { %3298 = vmatpush.bf16.msra.mxu0 %v4827_v57 }
 0x206   : > { %3264 = vmatpush.bf16.msrb.mxu1 %v4798_v38  ;;  %3291 = vmatpush.bf16.msra.mxu3 %v4813_v44 }
 0x209   : > { %3299 = vmatpush.bf16.msra.mxu0 %v4826_v1 }
 0x20a   : > { %3265 = vmatpush.bf16.msrb.mxu1 %v4797_v20 }
 0x20d   : > { %3300 = vmatpush.bf16.msra.mxu0 %v4825_v11 }
 0x211   : > { %3301 = vmatpush.bf16.msra.mxu0 %v4824_v19 }
 0x215   : > { %3302 = vmatpush.bf16.msra.mxu0 %v4823_v32 }
 0x23d   : > { %v2629_v27 = vpop.f32.mrf.mxu0 }
 0x23e   : > { %v2630_v51 = vadd.f32 %v2629_v27, %v2187_v49 }
 0x23f   : > { %v2642_v39 = vpop.f32.mrf.mxu1 }
 0x240   : > { %v2643_v62 = vadd.f32 %v2642_v39, %v2630_v51  ;;  %v4822_v39 = vld [vmem:[%s6216_s9 + $0xc8] sm:$0xff] }
 0x241   : > { %3303 = vmatpush.bf16.msra.mxu0 %v4822_v39 }
 0x245   : > { %v2631_v50 = vpop.f32.mrf.mxu0  ;;  %v2655_v48 = vpop.f32.mrf.mxu2  ;;  %3304 = vmatpush.bf16.msra.mxu0 %v4821_v5 }
 0x246   : > { %v2668_v52 = vpop.f32.mrf.mxu3  ;;  %v2656_v2 = vadd.f32 %v2655_v48, %v2643_v62 }
 0x247   : > { %v2644_v55 = vpop.f32.mrf.mxu1 }
 0x248   : > { %v2669_v12 = vadd.f32 %v2668_v52, %v2656_v2  ;;  %v2935_v52 = vperm.slane %v2771_v45, 2 }
 0x24d   : > { %v2657_v6 = vpop.f32.mrf.mxu2  ;;  %v2681_v7 = vpop.f32.mrf.mxu0 }
 0x24e   : > { %v2670_v8 = vpop.f32.mrf.mxu3  ;;  %v2682_v17 = vadd.f32 %v2681_v7, %v2669_v12 }
 0x24f   : > { %v2694_v9 = vpop.f32.mrf.mxu1 }
 0x250   : > { %v2695_v54 = vadd.f32 %v2694_v9, %v2682_v17  ;;  %v3065_v9 = vld [vmem:[%s6217_s10] sm:$0x1] }
 0x255   : > { %v2683_v24 = vpop.f32.mrf.mxu0  ;;  %v2707_v25 = vpop.f32.mrf.mxu2 }
 0x256   : > { %v2720_v26 = vpop.f32.mrf.mxu3  ;;  %v2708_v59 = vadd.f32 %v2707_v25, %v2695_v54 }
 0x257   : > { %v2696_v28 = vpop.f32.mrf.mxu1 }
 0x258   : > { %v2721_v34 = vadd.f32 %v2720_v26, %v2708_v59 }
 0x25d   : > { %v2709_v21 = vpop.f32.mrf.mxu2  ;;  %v2733_v13 = vpop.f32.mrf.mxu0 }
 0x25e   : > { %v2722_v27 = vpop.f32.mrf.mxu3  ;;  %v2734_v60 = vadd.f32 %v2733_v13, %v2721_v34 }
 0x260   : > { %v2737_v14 = vmax.f32 %v2734_v60, 0.0 }
 0x262   : > { %v2738_v35 = vpack.c.bf16 %v2737_v14, %v2737_v14 }
 0x264   : > { %2949 = vmatmul.bf16.vlgmr.msra.gmra.mxu1 %v2738_v35  ;;  %2962 = vmatmul.bf16.vlgmr.msrb.gmra.mxu2 %v2738_v35 }
 0x265   : > { %2975 = vmatmul.bf16.vlgmr.msrb.gmra.mxu3 %v2738_v35  ;;  %2988 = vmatmul.bf16.vlgmr.msrb.gmra.mxu0 %v2738_v35  ;;  %v2735_v36 = vpop.f32.mrf.mxu0 }
 0x2e1   : > { %v2950_v47 = vpop.f32.mrf.mxu1 }
 0x2e2   : > { %v2951_v49 = vadd.f32 %v2950_v47, %v2933_v42  ;;  %v2989_v50 = vpop.f32.mrf.mxu0 }
 0x2e3   : > { %v2990_v48 = vadd.f32 %v2989_v50, %v2936_v46 }
 0x2e4   : > { %v2993_v63 = vmax.f32 %v2951_v49, 0.0 }
 0x2e5   : > { %v2996_v51 = vmax.f32 %v2990_v48, 0.0 }
 0x2e6   : > { %v2997_v37 = vpack.c.bf16 %v2993_v63, %v2993_v63 }
 0x2e7   : > { %v3000_v53 = vpack.c.bf16 %v2996_v51, %v2996_v51  ;;  %v2963_v55 = vpop.f32.mrf.mxu2 }
 0x2e8   : > { %v2964_v56 = vadd.f32 %v2963_v55, %v2934_v15  ;;  %v2976_v57 = vpop.f32.mrf.mxu3  ;;  %3266 = vmatmul.bf16.vlgmr.msrb.gmra.mxu1 %v2997_v37 }
 0x2e9   : > { %v2977_v58 = vadd.f32 %v2976_v57, %v2935_v52  ;;  %3305 = vmatmul.bf16.vlgmr.msra.gmra.mxu0 %v3000_v53  ;;  %v2952_v61 = vpop.f32.mrf.mxu1 }
 0x2ea   : > { %v2994_v62 = vmax.f32 %v2964_v56, 0.0  ;;  %v2991_v0 = vpop.f32.mrf.mxu0 }
 0x2eb   : > { %v2995_v1 = vmax.f32 %v2977_v58, 0.0 }
 0x2ec   : > { %v2998_v2 = vpack.c.bf16 %v2994_v62, %v2994_v62 }
 0x2ed   : > { %v2999_v3 = vpack.c.bf16 %v2995_v1, %v2995_v1 }
 0x2ee   : > { %3279 = vmatmul.bf16.vlgmr.msra.gmra.mxu2 %v2998_v2 }
 0x2ef   : > { %3292 = vmatmul.bf16.vlgmr.msra.gmra.mxu3 %v2999_v3  ;;  %v2965_v4 = vpop.f32.mrf.mxu2 }
 0x2f0   : > { %v2978_v6 = vpop.f32.mrf.mxu3 }
 0x365   : > { %v3267_v7 = vpop.f32.mrf.mxu1 }
 0x366   : > { %v3306_v8 = vpop.f32.mrf.mxu0  ;;  %v3268_v12 = vadd.f32 %v3267_v7, %v3065_v9 }
 0x36d   : > { %v3269_v10 = vpop.f32.mrf.mxu1 }
 0x36e   : > { %v3308_v11 = vpop.f32.mrf.mxu0 }
 0x371   : > { %v3280_v16 = vpop.f32.mrf.mxu2 }
 0x372   : > { %v3281_v33 = vadd.f32 %v3280_v16, %v3268_v12  ;;  %v3293_v17 = vpop.f32.mrf.mxu3 }
 0x374   : > { %v3294_v43 = vadd.f32 %v3293_v17, %v3281_v33 }
 0x376   : > { %v3307_v19 = vadd.f32 %v3306_v8, %v3294_v43 }
 0x378   : > { %3310 = vst [vmem:[%s381_s12] sm:$0x1] %v3307_v19 }
 0x379   : > { %v3282_v22 = vpop.f32.mrf.mxu2 }
 0x37a   : > { %4897 = shalt.err (!%p4894_p3)
}
 0x37b   : > { %4829 = dma.vmem_to_hbm [thread:$0]  (%p5032_p5), %s3323_s14, 16, %s3325_s30, %s3312_s19   ;;  %v3295_v23 = vpop.f32.mrf.mxu3 }
 0x37c PF: > { %p4835_p4 = scmp.ge.s32.totalorder %s4932_s20, 2  ;;  %s3336_s24 = sand.u32 1, %s4920_s17  }
 0x37d   : > { %s3337_s29 = scalar_lea.sflag [#allocation3], %s3336_s24 }
 0x37e   : > { %p4832_p7 = pnand %p4835_p4, %p5036_p6 }
 0x380   : > { %p4833_p8 = pneg %p4832_p7 }
 0x382   : > { %4915 = dma.done.wait (%p4833_p8), %s3337_s29, 16  }
 0x383   : > { %4917 = vsyncadd (%p4833_p8), %s3337_s29, 4294967280  ;;  %s6227_s20 = sld [smem:[#allocation6_spill]]  ;;  %s6230_s17 = smov %s4924_s18 }
 0x384   : > { %s6228_s13 = sld [smem:[#allocation5_spill]] }
 0x385   : > { %s6229_s19 = sld [smem:[#allocation7_spill]] }
 0x389   : > { %p21_p9 = scmp.ge.s32.totalorder %s6227_s20, 4  }
 0x38a   : > { %s6231_s18 = smov %s6228_s13 }
 0x38b   :  { %23 = sbr.rel (!%p21_p9) target bundleno = 3 (0x3), region = 99 }
 0x390   :  { %3342 = vsyncpa [#allocation3], 1 }
 0x391   :  { %3344 = vsyncpa [#allocation3 + $0x1], 1 }

</bundles_post_ra>
